<compile_context>
chip_gen: v7x
topology: tpu7x:2x2x1
jax: 0.10.0
libtpu: 0.0.40
codegen_flags: <defaults>
</compile_context>

<pallas_src>
import math

import jax
import jax.numpy as jnp
from jax import lax
from jax.experimental import pallas as pl
from jax.experimental.pallas import tpu as pltpu  # noqa: F401


# ----------------------------- hyper-params ---------------------------------
class Params:
    latent_variable_size = 15          # zc feature dim = latent_variable_size + 1 = 16
    word_embed_size = 16
    decoder_rnn_size = 32              # H
    decoder_num_layers = 2             # kernel below is written for 2 layers
    word_vocab_size = 128              # V


# ------------------------------- kernel -------------------------------------
def _generator_kernel(x_ref,                     # (S*B, E)   time-major flattened input
                      zc_ref,                    # (B, Z)
                      wih0x_ref,                 # (E, 4H)  = Wih0[:, :E].T
                      wih0z_ref,                 # (Z, 4H)  = Wih0[:, E:].T
                      whh0_ref,                  # (H, 4H)  = Whh0.T
                      wih1_ref,                  # (H, 4H)  = Wih1.T
                      whh1_ref,                  # (H, 4H)  = Whh1.T
                      b0_ref, b1_ref,            # (1, 4H) each  (b_ih + b_hh)
                      wfc_ref, bfc_ref,          # (H, V), (1, V)
                      logits_ref,                # (S*B, V)  time-major flattened output
                      hn_ref, cn_ref):           # (L, B, H)
    SB = x_ref.shape[0]
    B = zc_ref.shape[0]
    H = whh0_ref.shape[0]
    S = SB // B
    f32 = jnp.float32

    whh0 = whh0_ref[...]
    wih1 = wih1_ref[...]
    whh1 = whh1_ref[...]
    b1 = b1_ref[...]

    # ---- hoisted, non-recurrent work -------------------------------------
    # layer-0 input projection for all time steps in one MXU matmul
    gx = jnp.dot(x_ref[...], wih0x_ref[...], preferred_element_type=f32)     # (S*B, 4H)
    # time-invariant zc contribution + biases folded into a per-batch bias,
    # pre-added to the per-step slices (off the recurrent chain)
    bias0 = (jnp.dot(zc_ref[...], wih0z_ref[...], preferred_element_type=f32)
             + b0_ref[...])                                                   # (B, 4H)
    gx_t = [gx[t * B:(t + 1) * B, :] + bias0 for t in range(S)]               # S x (B, 4H)

    def gates(z, c_prev):
        # one sigmoid + one tanh on the full (B, 4H) vreg, then lane-slice
        sg = jax.nn.sigmoid(z)
        th = jnp.tanh(z)
        i = sg[:, 0 * H:1 * H]
        f = sg[:, 1 * H:2 * H]
        o = sg[:, 3 * H:4 * H]
        g = th[:, 2 * H:3 * H]
        c = i * g if c_prev is None else f * c_prev + i * g
        h = o * jnp.tanh(c)
        return h, c

    # ---- layer-0 recurrence (serial chain) --------------------------------
    # The layer-1 input projection for step t is emitted right after h0_t so
    # it can overlap with the remaining layer-0 chain (it is independent of
    # the layer-1 recurrence).
    p1 = []
    h0, c0 = gates(gx_t[0], None)                       # t = 0 peeled (zero state)
    p1.append(jnp.dot(h0, wih1, preferred_element_type=f32) + b1)
    for t in range(1, S):
        z0 = gx_t[t] + jnp.dot(h0, whh0, preferred_element_type=f32)
        h0, c0 = gates(z0, c0)
        p1.append(jnp.dot(h0, wih1, preferred_element_type=f32) + b1)

    # ---- layer-1 recurrence (only h1 @ Whh1.T on this chain) ---------------
    h1s = []
    h1, c1 = gates(p1[0], None)                         # t = 0 peeled (zero state)
    h1s.append(h1)
    for t in range(1, S):
        z1 = p1[t] + jnp.dot(h1, whh1, preferred_element_type=f32)
        h1, c1 = gates(z1, c1)
        h1s.append(h1)

    # ---- hoisted FC head: one lane-dense (S*B, H) @ (H, V) matmul ----------
    h1_all = jnp.concatenate(h1s, axis=0)                                    # (S*B, H)
    logits_ref[...] = (jnp.dot(h1_all, wfc_ref[...], preferred_element_type=f32)
                       + bfc_ref[...]).astype(logits_ref.dtype)
    hn_ref[0] = h0.astype(hn_ref.dtype)
    hn_ref[1] = h1.astype(hn_ref.dtype)
    cn_ref[0] = c0.astype(cn_ref.dtype)
    cn_ref[1] = c1.astype(cn_ref.dtype)


def _run_generator(x_flat, zc, packed, *, S, B, H, V, L):
    """x_flat: (S*B, E) time-major; returns (logits_flat, h_n, c_n)."""
    out_shape = (
        jax.ShapeDtypeStruct((S * B, V), jnp.float32),   # logits (time-major flat)
        jax.ShapeDtypeStruct((L, B, H), jnp.float32),    # h_n
        jax.ShapeDtypeStruct((L, B, H), jnp.float32),    # c_n
    )
    # No grid: the whole problem (a few KB) lives in VMEM for one invocation.
    return pl.pallas_call(
        _generator_kernel,
        out_shape=out_shape,
    )(x_flat, zc, *packed)


# --------------------------- weight pre-packing -------------------------------
def pack_weights(weights, params):
    """Torch-convention weights -> pre-transposed / pre-split kernel operands."""
    E = params.word_embed_size
    (wih0, whh0, b0, wih1, whh1, b1, wfc, bfc) = weights
    return (wih0[:, :E].T,      # (E, 4H)
            wih0[:, E:].T,      # (Z, 4H)
            whh0.T,             # (H, 4H)
            wih1.T,             # (H, 4H)
            whh1.T,             # (H, 4H)
            b0, b1,             # (1, 4H) each
            wfc.T, bfc)         # (H, V), (1, V)


# ------------------------------ wrapper --------------------------------------
def generator_forward(generator_input, zc, drop_prob, weights, params,
                      dropout_key=None):
    """Mirrors Generator.forward (initial_state=None)."""
    B, S, E = generator_input.shape
    H = params.decoder_rnn_size
    V = params.word_vocab_size
    L = params.decoder_num_layers
    assert L == 2, "kernel is written for decoder_num_layers == 2"

    # F.dropout (inverted dropout).  RNG stream differs from torch by necessity.
    if drop_prob > 0.0:
        if dropout_key is None:
            raise ValueError("dropout_key is required when drop_prob > 0")
        keep = 1.0 - drop_prob
        mask = jax.random.bernoulli(dropout_key, keep, generator_input.shape)
        generator_input = jnp.where(mask, generator_input / keep, 0.0)

    # No zc broadcast/concat: the zc @ Wih0[:, E:].T term is folded into a
    # per-batch layer-0 bias inside the kernel.
    x_flat = jnp.transpose(generator_input, (1, 0, 2)).reshape(S * B, E)  # time-major
    packed = pack_weights(weights, params)
    logits_flat, h_n, c_n = _run_generator(
        x_flat, zc, packed, S=S, B=B, H=H, V=V, L=L)

    result = logits_flat.reshape(S, B, V).transpose(1, 0, 2)              # (B, S, V)
    return result, (h_n, c_n)


# --------------------------- deterministic init -------------------------------
def init_weights(params, key):
    H = params.decoder_rnn_size
    D_in = params.word_embed_size + params.latent_variable_size + 1
    V = params.word_vocab_size
    k = 1.0 / math.sqrt(H)
    keys = jax.random.split(key, 10)
    u = lambda kk, shape: jax.random.uniform(kk, shape, jnp.float32, -k, k)

    wih0 = u(keys[0], (4 * H, D_in))
    whh0 = u(keys[1], (4 * H, H))
    b0 = (u(keys[2], (4 * H,)) + u(keys[3], (4 * H,))).reshape(1, 4 * H)  # b_ih + b_hh
    wih1 = u(keys[4], (4 * H, H))
    whh1 = u(keys[5], (4 * H, H))
    b1 = (u(keys[6], (4 * H,)) + u(keys[7], (4 * H,))).reshape(1, 4 * H)
    kf = 1.0 / math.sqrt(H)
    wfc = jax.random.uniform(keys[8], (V, H), jnp.float32, -kf, kf)
    bfc = jax.random.uniform(keys[9], (1, V), jnp.float32, -kf, kf)
    return (wih0, whh0, b0, wih1, whh1, b1, wfc, bfc)


# ------------------------------ pure-JAX ref ----------------------------------
def reference_forward(generator_input, zc, weights, params):
    B, S, E = generator_input.shape
    Z = params.latent_variable_size + 1
    H = params.decoder_rnn_size
    L = params.decoder_num_layers
    (wih0, whh0, b0, wih1, whh1, b1, wfc, bfc) = weights
    layer_w = [(wih0, whh0, b0[0]), (wih1, whh1, b1[0])]

    zc_tiled = jnp.broadcast_to(zc[:, None, :], (B, S, Z))
    x = jnp.concatenate([generator_input, zc_tiled], axis=2)
    x_tm = jnp.transpose(x, (1, 0, 2))                         # (S, B, D_in)

    def step(carry, x_t):
        h, c = carry
        inp = x_t
        new_h, new_c = [], []
        for l in range(L):
            wih, whh, b = layer_w[l]
            gates = inp @ wih.T + h[l] @ whh.T + b
            i = jax.nn.sigmoid(gates[:, 0 * H:1 * H])
            f = jax.nn.sigmoid(gates[:, 1 * H:2 * H])
            g = jnp.tanh(gates[:, 2 * H:3 * H])
            o = jax.nn.sigmoid(gates[:, 3 * H:4 * H])
            cl = f * c[l] + i * g
            hl = o * jnp.tanh(cl)
            new_h.append(hl)
            new_c.append(cl)
            inp = hl
        return (jnp.stack(new_h), jnp.stack(new_c)), inp

    h0 = jnp.zeros((L, B, H), jnp.float32)
    c0 = jnp.zeros((L, B, H), jnp.float32)
    (h_n, c_n), rnn_out_tm = lax.scan(step, (h0, c0), x_tm)
    logits = jnp.einsum('sbh,vh->sbv', rnn_out_tm, wfc) + bfc[0]
    return jnp.transpose(logits, (1, 0, 2)), (h_n, c_n)


# --------------------------------- main ---------------------------------------
if __name__ == "__main__":
    params = Params()
    B, S = 2, 8
    key = jax.random.PRNGKey(0)
    k_in, k_zc, k_w = jax.random.split(key, 3)

    generator_input = jax.random.normal(
        k_in, (B, S, params.word_embed_size), jnp.float32)
    zc = jax.random.normal(
        k_zc, (B, params.latent_variable_size + 1), jnp.float32)
    weights = init_weights(params, k_w)

    drop_prob = 0.0  # TODO(synk): training-mode dropout RNG cannot match torch's stream
    result, (h_n, c_n) = generator_forward(
        generator_input, zc, drop_prob, weights, params)
    jax.block_until_ready(result)

    ref_result, (ref_h, ref_c) = reference_forward(
        generator_input, zc, weights, params)

    assert result.shape == (B, S, params.word_vocab_size)
    assert h_n.shape == (params.decoder_num_layers, B, params.decoder_rnn_size)
    assert jnp.allclose(result, ref_result, atol=1e-4, rtol=1e-4)
    assert jnp.allclose(h_n, ref_h, atol=1e-4, rtol=1e-4)
    assert jnp.allclose(c_n, ref_c, atol=1e-4, rtol=1e-4)

    print("KERNEL_OK")
</pallas_src>

<mosaic_0001>
module attributes {stable_mosaic.version = 11 : i64} {
  func.func @_generator_kernel(%arg0: memref<16x16xf32, #tpu.memory_space<vmem>>, %arg1: memref<2x16xf32, #tpu.memory_space<vmem>>, %arg2: memref<16x128xf32, #tpu.memory_space<vmem>>, %arg3: memref<16x128xf32, #tpu.memory_space<vmem>>, %arg4: memref<32x128xf32, #tpu.memory_space<vmem>>, %arg5: memref<32x128xf32, #tpu.memory_space<vmem>>, %arg6: memref<32x128xf32, #tpu.memory_space<vmem>>, %arg7: memref<1x128xf32, #tpu.memory_space<vmem>>, %arg8: memref<1x128xf32, #tpu.memory_space<vmem>>, %arg9: memref<32x128xf32, #tpu.memory_space<vmem>>, %arg10: memref<1x128xf32, #tpu.memory_space<vmem>>, %arg11: memref<16x128xf32, #tpu.memory_space<vmem>>, %arg12: memref<2x2x32xf32, #tpu.memory_space<vmem>>, %arg13: memref<2x2x32xf32, #tpu.memory_space<vmem>>) attributes {dimension_semantics = [], scalar_prefetch = 0 : i64, scratch_operands = 0 : i64, tpu.core_type = #tpu.core_type<tc>} {
    %c0 = arith.constant 0 : index
    %c0_0 = arith.constant 0 : index
    %0 = vector.load %arg4[%c0, %c0_0] : memref<32x128xf32, #tpu.memory_space<vmem>>, vector<32x128xf32>
    %c0_1 = arith.constant 0 : index
    %c0_2 = arith.constant 0 : index
    %1 = vector.load %arg5[%c0_1, %c0_2] : memref<32x128xf32, #tpu.memory_space<vmem>>, vector<32x128xf32>
    %c0_3 = arith.constant 0 : index
    %c0_4 = arith.constant 0 : index
    %2 = vector.load %arg6[%c0_3, %c0_4] : memref<32x128xf32, #tpu.memory_space<vmem>>, vector<32x128xf32>
    %c0_5 = arith.constant 0 : index
    %c0_6 = arith.constant 0 : index
    %3 = vector.load %arg8[%c0_5, %c0_6] : memref<1x128xf32, #tpu.memory_space<vmem>>, vector<1x128xf32>
    %c0_7 = arith.constant 0 : index
    %c0_8 = arith.constant 0 : index
    %4 = vector.load %arg0[%c0_7, %c0_8] : memref<16x16xf32, #tpu.memory_space<vmem>>, vector<16x16xf32>
    %c0_9 = arith.constant 0 : index
    %c0_10 = arith.constant 0 : index
    %5 = vector.load %arg2[%c0_9, %c0_10] : memref<16x128xf32, #tpu.memory_space<vmem>>, vector<16x128xf32>
    %cst = arith.constant dense<0.000000e+00> : vector<16x128xf32>
    %6 = tpu.matmul %4, %5, %cst {dimension_numbers = #tpu.dot_dimension_numbers<[1], [0], [0], [1], [0, 0, 1, 1], [], []>} : vector<16x16xf32>, vector<16x128xf32>, vector<16x128xf32> -> vector<16x128xf32>
    %c0_11 = arith.constant 0 : index
    %c0_12 = arith.constant 0 : index
    %7 = vector.load %arg1[%c0_11, %c0_12] : memref<2x16xf32, #tpu.memory_space<vmem>>, vector<2x16xf32>
    %c0_13 = arith.constant 0 : index
    %c0_14 = arith.constant 0 : index
    %8 = vector.load %arg3[%c0_13, %c0_14] : memref<16x128xf32, #tpu.memory_space<vmem>>, vector<16x128xf32>
    %cst_15 = arith.constant dense<0.000000e+00> : vector<2x128xf32>
    %9 = tpu.matmul %7, %8, %cst_15 {dimension_numbers = #tpu.dot_dimension_numbers<[1], [0], [0], [1], [0, 0, 1, 1], [], []>} : vector<2x16xf32>, vector<16x128xf32>, vector<2x128xf32> -> vector<2x128xf32>
    %c0_16 = arith.constant 0 : index
    %c0_17 = arith.constant 0 : index
    %10 = vector.load %arg7[%c0_16, %c0_17] : memref<1x128xf32, #tpu.memory_space<vmem>>, vector<1x128xf32>
    %11 = vector.broadcast %10 : vector<1x128xf32> to vector<2x128xf32>
    %12 = arith.addf %9, %11 : vector<2x128xf32>
    %13 = vector.extract_strided_slice %6 {offsets = [0, 0], sizes = [2, 128], strides = [1, 1]} : vector<16x128xf32> to vector<2x128xf32>
    %14 = arith.addf %13, %12 : vector<2x128xf32>
    %15 = vector.extract_strided_slice %6 {offsets = [2, 0], sizes = [2, 128], strides = [1, 1]} : vector<16x128xf32> to vector<2x128xf32>
    %16 = arith.addf %15, %12 : vector<2x128xf32>
    %17 = vector.extract_strided_slice %6 {offsets = [4, 0], sizes = [2, 128], strides = [1, 1]} : vector<16x128xf32> to vector<2x128xf32>
    %18 = arith.addf %17, %12 : vector<2x128xf32>
    %19 = vector.extract_strided_slice %6 {offsets = [6, 0], sizes = [2, 128], strides = [1, 1]} : vector<16x128xf32> to vector<2x128xf32>
    %20 = arith.addf %19, %12 : vector<2x128xf32>
    %21 = vector.extract_strided_slice %6 {offsets = [8, 0], sizes = [2, 128], strides = [1, 1]} : vector<16x128xf32> to vector<2x128xf32>
    %22 = arith.addf %21, %12 : vector<2x128xf32>
    %23 = vector.extract_strided_slice %6 {offsets = [10, 0], sizes = [2, 128], strides = [1, 1]} : vector<16x128xf32> to vector<2x128xf32>
    %24 = arith.addf %23, %12 : vector<2x128xf32>
    %25 = vector.extract_strided_slice %6 {offsets = [12, 0], sizes = [2, 128], strides = [1, 1]} : vector<16x128xf32> to vector<2x128xf32>
    %26 = arith.addf %25, %12 : vector<2x128xf32>
    %27 = vector.extract_strided_slice %6 {offsets = [14, 0], sizes = [2, 128], strides = [1, 1]} : vector<16x128xf32> to vector<2x128xf32>
    %28 = arith.addf %27, %12 : vector<2x128xf32>
    %29 = arith.negf %14 : vector<2x128xf32>
    %30 = math.exp %29 : vector<2x128xf32>
    %cst_18 = arith.constant 1.000000e+00 : f32
    %31 = vector.broadcast %cst_18 : f32 to vector<2x128xf32>
    %32 = arith.addf %31, %30 : vector<2x128xf32>
    %33 = arith.divf %31, %32 : vector<2x128xf32>
    %34 = math.tanh %14 : vector<2x128xf32>
    %35 = vector.extract_strided_slice %33 {offsets = [0, 0], sizes = [2, 32], strides = [1, 1]} : vector<2x128xf32> to vector<2x32xf32>
    %36 = vector.extract_strided_slice %33 {offsets = [0, 96], sizes = [2, 32], strides = [1, 1]} : vector<2x128xf32> to vector<2x32xf32>
    %37 = vector.extract_strided_slice %34 {offsets = [0, 64], sizes = [2, 32], strides = [1, 1]} : vector<2x128xf32> to vector<2x32xf32>
    %38 = arith.mulf %35, %37 : vector<2x32xf32>
    %39 = math.tanh %38 : vector<2x32xf32>
    %40 = arith.mulf %36, %39 : vector<2x32xf32>
    %cst_19 = arith.constant dense<0.000000e+00> : vector<2x128xf32>
    %41 = tpu.matmul %40, %1, %cst_19 {dimension_numbers = #tpu.dot_dimension_numbers<[1], [0], [0], [1], [0, 0, 1, 1], [], []>} : vector<2x32xf32>, vector<32x128xf32>, vector<2x128xf32> -> vector<2x128xf32>
    %42 = vector.broadcast %3 : vector<1x128xf32> to vector<2x128xf32>
    %43 = arith.addf %41, %42 : vector<2x128xf32>
    %cst_20 = arith.constant dense<0.000000e+00> : vector<2x128xf32>
    %44 = tpu.matmul %40, %0, %cst_20 {dimension_numbers = #tpu.dot_dimension_numbers<[1], [0], [0], [1], [0, 0, 1, 1], [], []>} : vector<2x32xf32>, vector<32x128xf32>, vector<2x128xf32> -> vector<2x128xf32>
    %45 = arith.addf %16, %44 : vector<2x128xf32>
    %46 = arith.negf %45 : vector<2x128xf32>
    %47 = math.exp %46 : vector<2x128xf32>
    %cst_21 = arith.constant 1.000000e+00 : f32
    %48 = vector.broadcast %cst_21 : f32 to vector<2x128xf32>
    %49 = arith.addf %48, %47 : vector<2x128xf32>
    %50 = arith.divf %48, %49 : vector<2x128xf32>
    %51 = math.tanh %45 : vector<2x128xf32>
    %52 = vector.extract_strided_slice %50 {offsets = [0, 0], sizes = [2, 32], strides = [1, 1]} : vector<2x128xf32> to vector<2x32xf32>
    %53 = vector.extract_strided_slice %50 {offsets = [0, 32], sizes = [2, 32], strides = [1, 1]} : vector<2x128xf32> to vector<2x32xf32>
    %54 = vector.extract_strided_slice %50 {offsets = [0, 96], sizes = [2, 32], strides = [1, 1]} : vector<2x128xf32> to vector<2x32xf32>
    %55 = vector.extract_strided_slice %51 {offsets = [0, 64], sizes = [2, 32], strides = [1, 1]} : vector<2x128xf32> to vector<2x32xf32>
    %56 = arith.mulf %53, %38 : vector<2x32xf32>
    %57 = arith.mulf %52, %55 : vector<2x32xf32>
    %58 = arith.addf %56, %57 : vector<2x32xf32>
    %59 = math.tanh %58 : vector<2x32xf32>
    %60 = arith.mulf %54, %59 : vector<2x32xf32>
    %cst_22 = arith.constant dense<0.000000e+00> : vector<2x128xf32>
    %61 = tpu.matmul %60, %1, %cst_22 {dimension_numbers = #tpu.dot_dimension_numbers<[1], [0], [0], [1], [0, 0, 1, 1], [], []>} : vector<2x32xf32>, vector<32x128xf32>, vector<2x128xf32> -> vector<2x128xf32>
    %62 = vector.broadcast %3 : vector<1x128xf32> to vector<2x128xf32>
    %63 = arith.addf %61, %62 : vector<2x128xf32>
    %cst_23 = arith.constant dense<0.000000e+00> : vector<2x128xf32>
    %64 = tpu.matmul %60, %0, %cst_23 {dimension_numbers = #tpu.dot_dimension_numbers<[1], [0], [0], [1], [0, 0, 1, 1], [], []>} : vector<2x32xf32>, vector<32x128xf32>, vector<2x128xf32> -> vector<2x128xf32>
    %65 = arith.addf %18, %64 : vector<2x128xf32>
    %66 = arith.negf %65 : vector<2x128xf32>
    %67 = math.exp %66 : vector<2x128xf32>
    %cst_24 = arith.constant 1.000000e+00 : f32
    %68 = vector.broadcast %cst_24 : f32 to vector<2x128xf32>
    %69 = arith.addf %68, %67 : vector<2x128xf32>
    %70 = arith.divf %68, %69 : vector<2x128xf32>
    %71 = math.tanh %65 : vector<2x128xf32>
    %72 = vector.extract_strided_slice %70 {offsets = [0, 0], sizes = [2, 32], strides = [1, 1]} : vector<2x128xf32> to vector<2x32xf32>
    %73 = vector.extract_strided_slice %70 {offsets = [0, 32], sizes = [2, 32], strides = [1, 1]} : vector<2x128xf32> to vector<2x32xf32>
    %74 = vector.extract_strided_slice %70 {offsets = [0, 96], sizes = [2, 32], strides = [1, 1]} : vector<2x128xf32> to vector<2x32xf32>
    %75 = vector.extract_strided_slice %71 {offsets = [0, 64], sizes = [2, 32], strides = [1, 1]} : vector<2x128xf32> to vector<2x32xf32>
    %76 = arith.mulf %73, %58 : vector<2x32xf32>
    %77 = arith.mulf %72, %75 : vector<2x32xf32>
    %78 = arith.addf %76, %77 : vector<2x32xf32>
    %79 = math.tanh %78 : vector<2x32xf32>
    %80 = arith.mulf %74, %79 : vector<2x32xf32>
    %cst_25 = arith.constant dense<0.000000e+00> : vector<2x128xf32>
    %81 = tpu.matmul %80, %1, %cst_25 {dimension_numbers = #tpu.dot_dimension_numbers<[1], [0], [0], [1], [0, 0, 1, 1], [], []>} : vector<2x32xf32>, vector<32x128xf32>, vector<2x128xf32> -> vector<2x128xf32>
    %82 = vector.broadcast %3 : vector<1x128xf32> to vector<2x128xf32>
    %83 = arith.addf %81, %82 : vector<2x128xf32>
    %cst_26 = arith.constant dense<0.000000e+00> : vector<2x128xf32>
    %84 = tpu.matmul %80, %0, %cst_26 {dimension_numbers = #tpu.dot_dimension_numbers<[1], [0], [0], [1], [0, 0, 1, 1], [], []>} : vector<2x32xf32>, vector<32x128xf32>, vector<2x128xf32> -> vector<2x128xf32>
    %85 = arith.addf %20, %84 : vector<2x128xf32>
    %86 = arith.negf %85 : vector<2x128xf32>
    %87 = math.exp %86 : vector<2x128xf32>
    %cst_27 = arith.constant 1.000000e+00 : f32
    %88 = vector.broadcast %cst_27 : f32 to vector<2x128xf32>
    %89 = arith.addf %88, %87 : vector<2x128xf32>
    %90 = arith.divf %88, %89 : vector<2x128xf32>
    %91 = math.tanh %85 : vector<2x128xf32>
    %92 = vector.extract_strided_slice %90 {offsets = [0, 0], sizes = [2, 32], strides = [1, 1]} : vector<2x128xf32> to vector<2x32xf32>
    %93 = vector.extract_strided_slice %90 {offsets = [0, 32], sizes = [2, 32], strides = [1, 1]} : vector<2x128xf32> to vector<2x32xf32>
    %94 = vector.extract_strided_slice %90 {offsets = [0, 96], sizes = [2, 32], strides = [1, 1]} : vector<2x128xf32> to vector<2x32xf32>
    %95 = vector.extract_strided_slice %91 {offsets = [0, 64], sizes = [2, 32], strides = [1, 1]} : vector<2x128xf32> to vector<2x32xf32>
    %96 = arith.mulf %93, %78 : vector<2x32xf32>
    %97 = arith.mulf %92, %95 : vector<2x32xf32>
    %98 = arith.addf %96, %97 : vector<2x32xf32>
    %99 = math.tanh %98 : vector<2x32xf32>
    %100 = arith.mulf %94, %99 : vector<2x32xf32>
    %cst_28 = arith.constant dense<0.000000e+00> : vector<2x128xf32>
    %101 = tpu.matmul %100, %1, %cst_28 {dimension_numbers = #tpu.dot_dimension_numbers<[1], [0], [0], [1], [0, 0, 1, 1], [], []>} : vector<2x32xf32>, vector<32x128xf32>, vector<2x128xf32> -> vector<2x128xf32>
    %102 = vector.broadcast %3 : vector<1x128xf32> to vector<2x128xf32>
    %103 = arith.addf %101, %102 : vector<2x128xf32>
    %cst_29 = arith.constant dense<0.000000e+00> : vector<2x128xf32>
    %104 = tpu.matmul %100, %0, %cst_29 {dimension_numbers = #tpu.dot_dimension_numbers<[1], [0], [0], [1], [0, 0, 1, 1], [], []>} : vector<2x32xf32>, vector<32x128xf32>, vector<2x128xf32> -> vector<2x128xf32>
    %105 = arith.addf %22, %104 : vector<2x128xf32>
    %106 = arith.negf %105 : vector<2x128xf32>
    %107 = math.exp %106 : vector<2x128xf32>
    %cst_30 = arith.constant 1.000000e+00 : f32
    %108 = vector.broadcast %cst_30 : f32 to vector<2x128xf32>
    %109 = arith.addf %108, %107 : vector<2x128xf32>
    %110 = arith.divf %108, %109 : vector<2x128xf32>
    %111 = math.tanh %105 : vector<2x128xf32>
    %112 = vector.extract_strided_slice %110 {offsets = [0, 0], sizes = [2, 32], strides = [1, 1]} : vector<2x128xf32> to vector<2x32xf32>
    %113 = vector.extract_strided_slice %110 {offsets = [0, 32], sizes = [2, 32], strides = [1, 1]} : vector<2x128xf32> to vector<2x32xf32>
    %114 = vector.extract_strided_slice %110 {offsets = [0, 96], sizes = [2, 32], strides = [1, 1]} : vector<2x128xf32> to vector<2x32xf32>
    %115 = vector.extract_strided_slice %111 {offsets = [0, 64], sizes = [2, 32], strides = [1, 1]} : vector<2x128xf32> to vector<2x32xf32>
    %116 = arith.mulf %113, %98 : vector<2x32xf32>
    %117 = arith.mulf %112, %115 : vector<2x32xf32>
    %118 = arith.addf %116, %117 : vector<2x32xf32>
    %119 = math.tanh %118 : vector<2x32xf32>
    %120 = arith.mulf %114, %119 : vector<2x32xf32>
    %cst_31 = arith.constant dense<0.000000e+00> : vector<2x128xf32>
    %121 = tpu.matmul %120, %1, %cst_31 {dimension_numbers = #tpu.dot_dimension_numbers<[1], [0], [0], [1], [0, 0, 1, 1], [], []>} : vector<2x32xf32>, vector<32x128xf32>, vector<2x128xf32> -> vector<2x128xf32>
    %122 = vector.broadcast %3 : vector<1x128xf32> to vector<2x128xf32>
    %123 = arith.addf %121, %122 : vector<2x128xf32>
    %cst_32 = arith.constant dense<0.000000e+00> : vector<2x128xf32>
    %124 = tpu.matmul %120, %0, %cst_32 {dimension_numbers = #tpu.dot_dimension_numbers<[1], [0], [0], [1], [0, 0, 1, 1], [], []>} : vector<2x32xf32>, vector<32x128xf32>, vector<2x128xf32> -> vector<2x128xf32>
    %125 = arith.addf %24, %124 : vector<2x128xf32>
    %126 = arith.negf %125 : vector<2x128xf32>
    %127 = math.exp %126 : vector<2x128xf32>
    %cst_33 = arith.constant 1.000000e+00 : f32
    %128 = vector.broadcast %cst_33 : f32 to vector<2x128xf32>
    %129 = arith.addf %128, %127 : vector<2x128xf32>
    %130 = arith.divf %128, %129 : vector<2x128xf32>
    %131 = math.tanh %125 : vector<2x128xf32>
    %132 = vector.extract_strided_slice %130 {offsets = [0, 0], sizes = [2, 32], strides = [1, 1]} : vector<2x128xf32> to vector<2x32xf32>
    %133 = vector.extract_strided_slice %130 {offsets = [0, 32], sizes = [2, 32], strides = [1, 1]} : vector<2x128xf32> to vector<2x32xf32>
    %134 = vector.extract_strided_slice %130 {offsets = [0, 96], sizes = [2, 32], strides = [1, 1]} : vector<2x128xf32> to vector<2x32xf32>
    %135 = vector.extract_strided_slice %131 {offsets = [0, 64], sizes = [2, 32], strides = [1, 1]} : vector<2x128xf32> to vector<2x32xf32>
    %136 = arith.mulf %133, %118 : vector<2x32xf32>
    %137 = arith.mulf %132, %135 : vector<2x32xf32>
    %138 = arith.addf %136, %137 : vector<2x32xf32>
    %139 = math.tanh %138 : vector<2x32xf32>
    %140 = arith.mulf %134, %139 : vector<2x32xf32>
    %cst_34 = arith.constant dense<0.000000e+00> : vector<2x128xf32>
    %141 = tpu.matmul %140, %1, %cst_34 {dimension_numbers = #tpu.dot_dimension_numbers<[1], [0], [0], [1], [0, 0, 1, 1], [], []>} : vector<2x32xf32>, vector<32x128xf32>, vector<2x128xf32> -> vector<2x128xf32>
    %142 = vector.broadcast %3 : vector<1x128xf32> to vector<2x128xf32>
    %143 = arith.addf %141, %142 : vector<2x128xf32>
    %cst_35 = arith.constant dense<0.000000e+00> : vector<2x128xf32>
    %144 = tpu.matmul %140, %0, %cst_35 {dimension_numbers = #tpu.dot_dimension_numbers<[1], [0], [0], [1], [0, 0, 1, 1], [], []>} : vector<2x32xf32>, vector<32x128xf32>, vector<2x128xf32> -> vector<2x128xf32>
    %145 = arith.addf %26, %144 : vector<2x128xf32>
    %146 = arith.negf %145 : vector<2x128xf32>
    %147 = math.exp %146 : vector<2x128xf32>
    %cst_36 = arith.constant 1.000000e+00 : f32
    %148 = vector.broadcast %cst_36 : f32 to vector<2x128xf32>
    %149 = arith.addf %148, %147 : vector<2x128xf32>
    %150 = arith.divf %148, %149 : vector<2x128xf32>
    %151 = math.tanh %145 : vector<2x128xf32>
    %152 = vector.extract_strided_slice %150 {offsets = [0, 0], sizes = [2, 32], strides = [1, 1]} : vector<2x128xf32> to vector<2x32xf32>
    %153 = vector.extract_strided_slice %150 {offsets = [0, 32], sizes = [2, 32], strides = [1, 1]} : vector<2x128xf32> to vector<2x32xf32>
    %154 = vector.extract_strided_slice %150 {offsets = [0, 96], sizes = [2, 32], strides = [1, 1]} : vector<2x128xf32> to vector<2x32xf32>
    %155 = vector.extract_strided_slice %151 {offsets = [0, 64], sizes = [2, 32], strides = [1, 1]} : vector<2x128xf32> to vector<2x32xf32>
    %156 = arith.mulf %153, %138 : vector<2x32xf32>
    %157 = arith.mulf %152, %155 : vector<2x32xf32>
    %158 = arith.addf %156, %157 : vector<2x32xf32>
    %159 = math.tanh %158 : vector<2x32xf32>
    %160 = arith.mulf %154, %159 : vector<2x32xf32>
    %cst_37 = arith.constant dense<0.000000e+00> : vector<2x128xf32>
    %161 = tpu.matmul %160, %1, %cst_37 {dimension_numbers = #tpu.dot_dimension_numbers<[1], [0], [0], [1], [0, 0, 1, 1], [], []>} : vector<2x32xf32>, vector<32x128xf32>, vector<2x128xf32> -> vector<2x128xf32>
    %162 = vector.broadcast %3 : vector<1x128xf32> to vector<2x128xf32>
    %163 = arith.addf %161, %162 : vector<2x128xf32>
    %cst_38 = arith.constant dense<0.000000e+00> : vector<2x128xf32>
    %164 = tpu.matmul %160, %0, %cst_38 {dimension_numbers = #tpu.dot_dimension_numbers<[1], [0], [0], [1], [0, 0, 1, 1], [], []>} : vector<2x32xf32>, vector<32x128xf32>, vector<2x128xf32> -> vector<2x128xf32>
    %165 = arith.addf %28, %164 : vector<2x128xf32>
    %166 = arith.negf %165 : vector<2x128xf32>
    %167 = math.exp %166 : vector<2x128xf32>
    %cst_39 = arith.constant 1.000000e+00 : f32
    %168 = vector.broadcast %cst_39 : f32 to vector<2x128xf32>
    %169 = arith.addf %168, %167 : vector<2x128xf32>
    %170 = arith.divf %168, %169 : vector<2x128xf32>
    %171 = math.tanh %165 : vector<2x128xf32>
    %172 = vector.extract_strided_slice %170 {offsets = [0, 0], sizes = [2, 32], strides = [1, 1]} : vector<2x128xf32> to vector<2x32xf32>
    %173 = vector.extract_strided_slice %170 {offsets = [0, 32], sizes = [2, 32], strides = [1, 1]} : vector<2x128xf32> to vector<2x32xf32>
    %174 = vector.extract_strided_slice %170 {offsets = [0, 96], sizes = [2, 32], strides = [1, 1]} : vector<2x128xf32> to vector<2x32xf32>
    %175 = vector.extract_strided_slice %171 {offsets = [0, 64], sizes = [2, 32], strides = [1, 1]} : vector<2x128xf32> to vector<2x32xf32>
    %176 = arith.mulf %173, %158 : vector<2x32xf32>
    %177 = arith.mulf %172, %175 : vector<2x32xf32>
    %178 = arith.addf %176, %177 : vector<2x32xf32>
    %179 = math.tanh %178 : vector<2x32xf32>
    %180 = arith.mulf %174, %179 : vector<2x32xf32>
    %cst_40 = arith.constant dense<0.000000e+00> : vector<2x128xf32>
    %181 = tpu.matmul %180, %1, %cst_40 {dimension_numbers = #tpu.dot_dimension_numbers<[1], [0], [0], [1], [0, 0, 1, 1], [], []>} : vector<2x32xf32>, vector<32x128xf32>, vector<2x128xf32> -> vector<2x128xf32>
    %182 = vector.broadcast %3 : vector<1x128xf32> to vector<2x128xf32>
    %183 = arith.addf %181, %182 : vector<2x128xf32>
    %184 = arith.negf %43 : vector<2x128xf32>
    %185 = math.exp %184 : vector<2x128xf32>
    %cst_41 = arith.constant 1.000000e+00 : f32
    %186 = vector.broadcast %cst_41 : f32 to vector<2x128xf32>
    %187 = arith.addf %186, %185 : vector<2x128xf32>
    %188 = arith.divf %186, %187 : vector<2x128xf32>
    %189 = math.tanh %43 : vector<2x128xf32>
    %190 = vector.extract_strided_slice %188 {offsets = [0, 0], sizes = [2, 32], strides = [1, 1]} : vector<2x128xf32> to vector<2x32xf32>
    %191 = vector.extract_strided_slice %188 {offsets = [0, 96], sizes = [2, 32], strides = [1, 1]} : vector<2x128xf32> to vector<2x32xf32>
    %192 = vector.extract_strided_slice %189 {offsets = [0, 64], sizes = [2, 32], strides = [1, 1]} : vector<2x128xf32> to vector<2x32xf32>
    %193 = arith.mulf %190, %192 : vector<2x32xf32>
    %194 = math.tanh %193 : vector<2x32xf32>
    %195 = arith.mulf %191, %194 : vector<2x32xf32>
    %cst_42 = arith.constant dense<0.000000e+00> : vector<2x128xf32>
    %196 = tpu.matmul %195, %2, %cst_42 {dimension_numbers = #tpu.dot_dimension_numbers<[1], [0], [0], [1], [0, 0, 1, 1], [], []>} : vector<2x32xf32>, vector<32x128xf32>, vector<2x128xf32> -> vector<2x128xf32>
    %197 = arith.addf %63, %196 : vector<2x128xf32>
    %198 = arith.negf %197 : vector<2x128xf32>
    %199 = math.exp %198 : vector<2x128xf32>
    %cst_43 = arith.constant 1.000000e+00 : f32
    %200 = vector.broadcast %cst_43 : f32 to vector<2x128xf32>
    %201 = arith.addf %200, %199 : vector<2x128xf32>
    %202 = arith.divf %200, %201 : vector<2x128xf32>
    %203 = math.tanh %197 : vector<2x128xf32>
    %204 = vector.extract_strided_slice %202 {offsets = [0, 0], sizes = [2, 32], strides = [1, 1]} : vector<2x128xf32> to vector<2x32xf32>
    %205 = vector.extract_strided_slice %202 {offsets = [0, 32], sizes = [2, 32], strides = [1, 1]} : vector<2x128xf32> to vector<2x32xf32>
    %206 = vector.extract_strided_slice %202 {offsets = [0, 96], sizes = [2, 32], strides = [1, 1]} : vector<2x128xf32> to vector<2x32xf32>
    %207 = vector.extract_strided_slice %203 {offsets = [0, 64], sizes = [2, 32], strides = [1, 1]} : vector<2x128xf32> to vector<2x32xf32>
    %208 = arith.mulf %205, %193 : vector<2x32xf32>
    %209 = arith.mulf %204, %207 : vector<2x32xf32>
    %210 = arith.addf %208, %209 : vector<2x32xf32>
    %211 = math.tanh %210 : vector<2x32xf32>
    %212 = arith.mulf %206, %211 : vector<2x32xf32>
    %cst_44 = arith.constant dense<0.000000e+00> : vector<2x128xf32>
    %213 = tpu.matmul %212, %2, %cst_44 {dimension_numbers = #tpu.dot_dimension_numbers<[1], [0], [0], [1], [0, 0, 1, 1], [], []>} : vector<2x32xf32>, vector<32x128xf32>, vector<2x128xf32> -> vector<2x128xf32>
    %214 = arith.addf %83, %213 : vector<2x128xf32>
    %215 = arith.negf %214 : vector<2x128xf32>
    %216 = math.exp %215 : vector<2x128xf32>
    %cst_45 = arith.constant 1.000000e+00 : f32
    %217 = vector.broadcast %cst_45 : f32 to vector<2x128xf32>
    %218 = arith.addf %217, %216 : vector<2x128xf32>
    %219 = arith.divf %217, %218 : vector<2x128xf32>
    %220 = math.tanh %214 : vector<2x128xf32>
    %221 = vector.extract_strided_slice %219 {offsets = [0, 0], sizes = [2, 32], strides = [1, 1]} : vector<2x128xf32> to vector<2x32xf32>
    %222 = vector.extract_strided_slice %219 {offsets = [0, 32], sizes = [2, 32], strides = [1, 1]} : vector<2x128xf32> to vector<2x32xf32>
    %223 = vector.extract_strided_slice %219 {offsets = [0, 96], sizes = [2, 32], strides = [1, 1]} : vector<2x128xf32> to vector<2x32xf32>
    %224 = vector.extract_strided_slice %220 {offsets = [0, 64], sizes = [2, 32], strides = [1, 1]} : vector<2x128xf32> to vector<2x32xf32>
    %225 = arith.mulf %222, %210 : vector<2x32xf32>
    %226 = arith.mulf %221, %224 : vector<2x32xf32>
    %227 = arith.addf %225, %226 : vector<2x32xf32>
    %228 = math.tanh %227 : vector<2x32xf32>
    %229 = arith.mulf %223, %228 : vector<2x32xf32>
    %cst_46 = arith.constant dense<0.000000e+00> : vector<2x128xf32>
    %230 = tpu.matmul %229, %2, %cst_46 {dimension_numbers = #tpu.dot_dimension_numbers<[1], [0], [0], [1], [0, 0, 1, 1], [], []>} : vector<2x32xf32>, vector<32x128xf32>, vector<2x128xf32> -> vector<2x128xf32>
    %231 = arith.addf %103, %230 : vector<2x128xf32>
    %232 = arith.negf %231 : vector<2x128xf32>
    %233 = math.exp %232 : vector<2x128xf32>
    %cst_47 = arith.constant 1.000000e+00 : f32
    %234 = vector.broadcast %cst_47 : f32 to vector<2x128xf32>
    %235 = arith.addf %234, %233 : vector<2x128xf32>
    %236 = arith.divf %234, %235 : vector<2x128xf32>
    %237 = math.tanh %231 : vector<2x128xf32>
    %238 = vector.extract_strided_slice %236 {offsets = [0, 0], sizes = [2, 32], strides = [1, 1]} : vector<2x128xf32> to vector<2x32xf32>
    %239 = vector.extract_strided_slice %236 {offsets = [0, 32], sizes = [2, 32], strides = [1, 1]} : vector<2x128xf32> to vector<2x32xf32>
    %240 = vector.extract_strided_slice %236 {offsets = [0, 96], sizes = [2, 32], strides = [1, 1]} : vector<2x128xf32> to vector<2x32xf32>
    %241 = vector.extract_strided_slice %237 {offsets = [0, 64], sizes = [2, 32], strides = [1, 1]} : vector<2x128xf32> to vector<2x32xf32>
    %242 = arith.mulf %239, %227 : vector<2x32xf32>
    %243 = arith.mulf %238, %241 : vector<2x32xf32>
    %244 = arith.addf %242, %243 : vector<2x32xf32>
    %245 = math.tanh %244 : vector<2x32xf32>
    %246 = arith.mulf %240, %245 : vector<2x32xf32>
    %cst_48 = arith.constant dense<0.000000e+00> : vector<2x128xf32>
    %247 = tpu.matmul %246, %2, %cst_48 {dimension_numbers = #tpu.dot_dimension_numbers<[1], [0], [0], [1], [0, 0, 1, 1], [], []>} : vector<2x32xf32>, vector<32x128xf32>, vector<2x128xf32> -> vector<2x128xf32>
    %248 = arith.addf %123, %247 : vector<2x128xf32>
    %249 = arith.negf %248 : vector<2x128xf32>
    %250 = math.exp %249 : vector<2x128xf32>
    %cst_49 = arith.constant 1.000000e+00 : f32
    %251 = vector.broadcast %cst_49 : f32 to vector<2x128xf32>
    %252 = arith.addf %251, %250 : vector<2x128xf32>
    %253 = arith.divf %251, %252 : vector<2x128xf32>
    %254 = math.tanh %248 : vector<2x128xf32>
    %255 = vector.extract_strided_slice %253 {offsets = [0, 0], sizes = [2, 32], strides = [1, 1]} : vector<2x128xf32> to vector<2x32xf32>
    %256 = vector.extract_strided_slice %253 {offsets = [0, 32], sizes = [2, 32], strides = [1, 1]} : vector<2x128xf32> to vector<2x32xf32>
    %257 = vector.extract_strided_slice %253 {offsets = [0, 96], sizes = [2, 32], strides = [1, 1]} : vector<2x128xf32> to vector<2x32xf32>
    %258 = vector.extract_strided_slice %254 {offsets = [0, 64], sizes = [2, 32], strides = [1, 1]} : vector<2x128xf32> to vector<2x32xf32>
    %259 = arith.mulf %256, %244 : vector<2x32xf32>
    %260 = arith.mulf %255, %258 : vector<2x32xf32>
    %261 = arith.addf %259, %260 : vector<2x32xf32>
    %262 = math.tanh %261 : vector<2x32xf32>
    %263 = arith.mulf %257, %262 : vector<2x32xf32>
    %cst_50 = arith.constant dense<0.000000e+00> : vector<2x128xf32>
    %264 = tpu.matmul %263, %2, %cst_50 {dimension_numbers = #tpu.dot_dimension_numbers<[1], [0], [0], [1], [0, 0, 1, 1], [], []>} : vector<2x32xf32>, vector<32x128xf32>, vector<2x128xf32> -> vector<2x128xf32>
    %265 = arith.addf %143, %264 : vector<2x128xf32>
    %266 = arith.negf %265 : vector<2x128xf32>
    %267 = math.exp %266 : vector<2x128xf32>
    %cst_51 = arith.constant 1.000000e+00 : f32
    %268 = vector.broadcast %cst_51 : f32 to vector<2x128xf32>
    %269 = arith.addf %268, %267 : vector<2x128xf32>
    %270 = arith.divf %268, %269 : vector<2x128xf32>
    %271 = math.tanh %265 : vector<2x128xf32>
    %272 = vector.extract_strided_slice %270 {offsets = [0, 0], sizes = [2, 32], strides = [1, 1]} : vector<2x128xf32> to vector<2x32xf32>
    %273 = vector.extract_strided_slice %270 {offsets = [0, 32], sizes = [2, 32], strides = [1, 1]} : vector<2x128xf32> to vector<2x32xf32>
    %274 = vector.extract_strided_slice %270 {offsets = [0, 96], sizes = [2, 32], strides = [1, 1]} : vector<2x128xf32> to vector<2x32xf32>
    %275 = vector.extract_strided_slice %271 {offsets = [0, 64], sizes = [2, 32], strides = [1, 1]} : vector<2x128xf32> to vector<2x32xf32>
    %276 = arith.mulf %273, %261 : vector<2x32xf32>
    %277 = arith.mulf %272, %275 : vector<2x32xf32>
    %278 = arith.addf %276, %277 : vector<2x32xf32>
    %279 = math.tanh %278 : vector<2x32xf32>
    %280 = arith.mulf %274, %279 : vector<2x32xf32>
    %cst_52 = arith.constant dense<0.000000e+00> : vector<2x128xf32>
    %281 = tpu.matmul %280, %2, %cst_52 {dimension_numbers = #tpu.dot_dimension_numbers<[1], [0], [0], [1], [0, 0, 1, 1], [], []>} : vector<2x32xf32>, vector<32x128xf32>, vector<2x128xf32> -> vector<2x128xf32>
    %282 = arith.addf %163, %281 : vector<2x128xf32>
    %283 = arith.negf %282 : vector<2x128xf32>
    %284 = math.exp %283 : vector<2x128xf32>
    %cst_53 = arith.constant 1.000000e+00 : f32
    %285 = vector.broadcast %cst_53 : f32 to vector<2x128xf32>
    %286 = arith.addf %285, %284 : vector<2x128xf32>
    %287 = arith.divf %285, %286 : vector<2x128xf32>
    %288 = math.tanh %282 : vector<2x128xf32>
    %289 = vector.extract_strided_slice %287 {offsets = [0, 0], sizes = [2, 32], strides = [1, 1]} : vector<2x128xf32> to vector<2x32xf32>
    %290 = vector.extract_strided_slice %287 {offsets = [0, 32], sizes = [2, 32], strides = [1, 1]} : vector<2x128xf32> to vector<2x32xf32>
    %291 = vector.extract_strided_slice %287 {offsets = [0, 96], sizes = [2, 32], strides = [1, 1]} : vector<2x128xf32> to vector<2x32xf32>
    %292 = vector.extract_strided_slice %288 {offsets = [0, 64], sizes = [2, 32], strides = [1, 1]} : vector<2x128xf32> to vector<2x32xf32>
    %293 = arith.mulf %290, %278 : vector<2x32xf32>
    %294 = arith.mulf %289, %292 : vector<2x32xf32>
    %295 = arith.addf %293, %294 : vector<2x32xf32>
    %296 = math.tanh %295 : vector<2x32xf32>
    %297 = arith.mulf %291, %296 : vector<2x32xf32>
    %cst_54 = arith.constant dense<0.000000e+00> : vector<2x128xf32>
    %298 = tpu.matmul %297, %2, %cst_54 {dimension_numbers = #tpu.dot_dimension_numbers<[1], [0], [0], [1], [0, 0, 1, 1], [], []>} : vector<2x32xf32>, vector<32x128xf32>, vector<2x128xf32> -> vector<2x128xf32>
    %299 = arith.addf %183, %298 : vector<2x128xf32>
    %300 = arith.negf %299 : vector<2x128xf32>
    %301 = math.exp %300 : vector<2x128xf32>
    %cst_55 = arith.constant 1.000000e+00 : f32
    %302 = vector.broadcast %cst_55 : f32 to vector<2x128xf32>
    %303 = arith.addf %302, %301 : vector<2x128xf32>
    %304 = arith.divf %302, %303 : vector<2x128xf32>
    %305 = math.tanh %299 : vector<2x128xf32>
    %306 = vector.extract_strided_slice %304 {offsets = [0, 0], sizes = [2, 32], strides = [1, 1]} : vector<2x128xf32> to vector<2x32xf32>
    %307 = vector.extract_strided_slice %304 {offsets = [0, 32], sizes = [2, 32], strides = [1, 1]} : vector<2x128xf32> to vector<2x32xf32>
    %308 = vector.extract_strided_slice %304 {offsets = [0, 96], sizes = [2, 32], strides = [1, 1]} : vector<2x128xf32> to vector<2x32xf32>
    %309 = vector.extract_strided_slice %305 {offsets = [0, 64], sizes = [2, 32], strides = [1, 1]} : vector<2x128xf32> to vector<2x32xf32>
    %310 = arith.mulf %307, %295 : vector<2x32xf32>
    %311 = arith.mulf %306, %309 : vector<2x32xf32>
    %312 = arith.addf %310, %311 : vector<2x32xf32>
    %313 = math.tanh %312 : vector<2x32xf32>
    %314 = arith.mulf %308, %313 : vector<2x32xf32>
    %315 = tpu.concatenate %195, %212, %229, %246, %263, %280, %297, %314 in 0 : vector<2x32xf32>, vector<2x32xf32>, vector<2x32xf32>, vector<2x32xf32>, vector<2x32xf32>, vector<2x32xf32>, vector<2x32xf32>, vector<2x32xf32> -> vector<16x32xf32>
    %c0_56 = arith.constant 0 : index
    %c0_57 = arith.constant 0 : index
    %316 = vector.load %arg9[%c0_56, %c0_57] : memref<32x128xf32, #tpu.memory_space<vmem>>, vector<32x128xf32>
    %cst_58 = arith.constant dense<0.000000e+00> : vector<16x128xf32>
    %317 = tpu.matmul %315, %316, %cst_58 {dimension_numbers = #tpu.dot_dimension_numbers<[1], [0], [0], [1], [0, 0, 1, 1], [], []>} : vector<16x32xf32>, vector<32x128xf32>, vector<16x128xf32> -> vector<16x128xf32>
    %c0_59 = arith.constant 0 : index
    %c0_60 = arith.constant 0 : index
    %318 = vector.load %arg10[%c0_59, %c0_60] : memref<1x128xf32, #tpu.memory_space<vmem>>, vector<1x128xf32>
    %319 = vector.broadcast %318 : vector<1x128xf32> to vector<16x128xf32>
    %320 = arith.addf %317, %319 : vector<16x128xf32>
    %c0_61 = arith.constant 0 : index
    %c0_62 = arith.constant 0 : index
    %321 = vector.load %arg11[%c0_61, %c0_62] : memref<16x128xf32, #tpu.memory_space<vmem>>, vector<16x128xf32>
    tpu.vector_store %arg11[%c0_61, %c0_62], %320 {strides = array<i32>} : memref<16x128xf32, #tpu.memory_space<vmem>>, vector<16x128xf32>,
    %c0_63 = arith.constant 0 : index
    %c0_64 = arith.constant 0 : index
    %c0_65 = arith.constant 0 : index
    %322 = vector.load %arg12[%c0_63, %c0_64, %c0_65] : memref<2x2x32xf32, #tpu.memory_space<vmem>>, vector<1x2x32xf32>
    %323 = vector.shape_cast %322 : vector<1x2x32xf32> to vector<2x32xf32>
    %324 = vector.shape_cast %180 : vector<2x32xf32> to vector<1x2x32xf32>
    tpu.vector_store %arg12[%c0_63, %c0_64, %c0_65], %324 {strides = array<i32>} : memref<2x2x32xf32, #tpu.memory_space<vmem>>, vector<1x2x32xf32>,
    %c1 = arith.constant 1 : index
    %c0_66 = arith.constant 0 : index
    %c0_67 = arith.constant 0 : index
    %325 = vector.load %arg12[%c1, %c0_66, %c0_67] : memref<2x2x32xf32, #tpu.memory_space<vmem>>, vector<1x2x32xf32>
    %326 = vector.shape_cast %325 : vector<1x2x32xf32> to vector<2x32xf32>
    %327 = vector.shape_cast %314 : vector<2x32xf32> to vector<1x2x32xf32>
    tpu.vector_store %arg12[%c1, %c0_66, %c0_67], %327 {strides = array<i32>} : memref<2x2x32xf32, #tpu.memory_space<vmem>>, vector<1x2x32xf32>,
    %c0_68 = arith.constant 0 : index
    %c0_69 = arith.constant 0 : index
    %c0_70 = arith.constant 0 : index
    %328 = vector.load %arg13[%c0_68, %c0_69, %c0_70] : memref<2x2x32xf32, #tpu.memory_space<vmem>>, vector<1x2x32xf32>
    %329 = vector.shape_cast %328 : vector<1x2x32xf32> to vector<2x32xf32>
    %330 = vector.shape_cast %178 : vector<2x32xf32> to vector<1x2x32xf32>
    tpu.vector_store %arg13[%c0_68, %c0_69, %c0_70], %330 {strides = array<i32>} : memref<2x2x32xf32, #tpu.memory_space<vmem>>, vector<1x2x32xf32>,
    %c1_71 = arith.constant 1 : index
    %c0_72 = arith.constant 0 : index
    %c0_73 = arith.constant 0 : index
    %331 = vector.load %arg13[%c1_71, %c0_72, %c0_73] : memref<2x2x32xf32, #tpu.memory_space<vmem>>, vector<1x2x32xf32>
    %332 = vector.shape_cast %331 : vector<1x2x32xf32> to vector<2x32xf32>
    %333 = vector.shape_cast %312 : vector<2x32xf32> to vector<1x2x32xf32>
    tpu.vector_store %arg13[%c1_71, %c0_72, %c0_73], %333 {strides = array<i32>} : memref<2x2x32xf32, #tpu.memory_space<vmem>>, vector<1x2x32xf32>,
    return
  }
}

</mosaic_0001>

<bundles_post_ra>
// kernel: tpu_custom_call.1
= control target key start
LH: loop header
LB: loop body
LE: loop exit
PB: predicated region body
PF: predicated region fallthrough
CT: control target
= control target key end

     0   :  { %19 = vsyncpa [#allocation3], 0  ;;  %s4198_s0 = inlined_call_operand.hbm [shape: f32[16,16], index: 0, kind: input, shape index: {}]   ;;  %s4199_s1 = inlined_call_operand.vmem [shape: f32[2,16], index: 1, kind: input, shape index: {}]   ;;  %s4200_s2 = inlined_call_operand.hbm [shape: f32[16,128], index: 2, kind: input, shape index: {}]   ;;  %s4201_s3 = inlined_call_operand.hbm [shape: f32[16,128], index: 3, kind: input, shape index: {}]   ;;  %s4202_s4 = inlined_call_operand.hbm [shape: f32[32,128], index: 4, kind: input, shape index: {}]   ;;  %s4203_s5 = inlined_call_operand.hbm [shape: f32[32,128], index: 5, kind: input, shape index: {}]   ;;  %s4204_s6 = inlined_call_operand.hbm [shape: f32[32,128], index: 6, kind: input, shape index: {}]   ;;  %s4205_s7 = inlined_call_operand.hbm [shape: f32[1,128], index: 7, kind: input, shape index: {}]   ;;  %s4206_s8 = inlined_call_operand.hbm [shape: f32[1,128], index: 8, kind: input, shape index: {}]   ;;  %s4207_s9 = inlined_call_operand.vmem [shape: f32[32,128], index: 9, kind: input, shape index: {}]   ;;  %s4208_s10 = inlined_call_operand.vmem [shape: f32[1,128], index: 10, kind: input, shape index: {}]   ;;  %s4209_s11 = inlined_call_operand.hbm [shape: f32[16,128], index: 11, kind: output, shape index: {0}]   ;;  %s4210_s12 = inlined_call_operand.hbm [shape: f32[2,2,32], index: 12, kind: output, shape index: {1}]   ;;  %s4211_s13 = inlined_call_operand.hbm [shape: f32[2,2,32], index: 13, kind: output, shape index: {2}]  }
   0x1   :  { %20 = vsyncpa [#allocation6], 0 }
   0x2   :  { %21 = vsyncpa [#allocation9], 0 }
   0x3   :  { %22 = vsyncpa [#allocation12], 0 }
   0x4   :  { %23 = vsyncpa [#allocation15], 0 }
   0x5   :  { %24 = vsyncpa [#allocation4], 0 }
   0x6   :  { %25 = vsyncpa [#allocation18], 0  ;;  %s3604_s25 = smov [#allocation5]   ;;  %s3605_s27 = smov [#allocation8]  }
   0x7   :  { %s45_s26 = sshll.u32 %s3604_s25, 4  ;;  %s69_s28 = sshll.u32 %s3605_s27, 4  ;;  %s46_s26 = int_to_ptr.vmem [resolvable:$true] %s45_s26  ;;  %s3694_s28 = int_to_ptr.vmem [resolvable:$true] %s69_s28 }
   0x8   :  { %s3348_s14 = scalar_lea.hbm %s4200_s2, 256 }
   0x9   :  { %p3349_p0 = scmp.ne.s32.totalorder %s4200_s2, %s3348_s14  ;;  %p3352_p1 = scmp.lt.u32.totalorder %s3348_s14, %s4200_s2 }
   0xb   :  { %p3354_p2 = pnand %p3352_p1, %p3349_p0 }
   0xd   :  { %3357 = shalt.err (!%p3354_p2)
}
   0xe   :  { %s3358_s19 = scalar_lea.vmem %s46_s26, 256  ;;  %p3363_p4 = scmp.lt.s32.totalorder %s46_s26, %s46_s26 }
   0xf   :  { %p3359_p3 = scmp.ne.s32.totalorder %s46_s26, %s3358_s19  ;;  %p3364_p5 = scmp.lt.s32.totalorder %s3358_s19, %s3358_s19 }
  0x11   :  { %p3365_p6 = por %p3364_p5, %p3363_p4 }
  0x13   :  { %p3366_p7 = pnand %p3365_p6, %p3359_p3 }
  0x15   :  { %3369 = shalt.err (!%p3366_p7)
}
  0x16   :  { %s3606_s20 = smov 128   ;;  %s3607_s21 = smov 8  }
  0x17   :  { %51 = dma.hbm_to_vmem [thread:$0]  %s4200_s2, 256, %s46_s26, [#allocation6], %s3606_s20, %s3606_s20, %s3607_s21  }
  0x18   :  { %s3370_s27 = scalar_lea.hbm %s4202_s4, 512 }
  0x19   :  { %p3371_p8 = scmp.ne.s32.totalorder %s4202_s4, %s3370_s27  ;;  %p3374_p9 = scmp.lt.u32.totalorder %s3370_s27, %s4202_s4 }
  0x1b   :  { %p3376_p10 = pnand %p3374_p9, %p3371_p8 }
  0x1d   :  { %3379 = shalt.err (!%p3376_p10)
}
  0x1e   :  { %s3380_s16 = scalar_lea.vmem %s3694_s28, 512  ;;  %p3385_p12 = scmp.lt.s32.totalorder %s3694_s28, %s3694_s28 }
  0x1f   :  { %p3381_p11 = scmp.ne.s32.totalorder %s3694_s28, %s3380_s16  ;;  %p3386_p13 = scmp.lt.s32.totalorder %s3380_s16, %s3380_s16 }
  0x21   :  { %p3387_p0 = por %p3386_p13, %p3385_p12 }
  0x23   :  { %p3388_p1 = pnand %p3387_p0, %p3381_p11 }
  0x25   :  { %3391 = shalt.err (!%p3388_p1)
}
  0x26   :  { %75 = dma.hbm_to_vmem [thread:$0]  %s4202_s4, 512, %s3694_s28, [#allocation9], %s3606_s20, %s3606_s20, %s3607_s21  }
  0x27   :  { %s3608_s17 = smov [#allocation11]   ;;  %s3609_s19 = smov [#allocation2]  }
  0x28   :  { %s93_s18 = sshll.u32 %s3608_s17, 4  ;;  %s31_s22 = sshll.u32 %s3609_s19, 4  ;;  %s94_s18 = int_to_ptr.vmem [resolvable:$true] %s93_s18  ;;  %s3731_s22 = int_to_ptr.vmem [resolvable:$true] %s31_s22 }
  0x29   :  { %s3392_s25 = scalar_lea.hbm %s4204_s6, 512 }
  0x2a   :  { %p3393_p2 = scmp.ne.s32.totalorder %s4204_s6, %s3392_s25  ;;  %p3396_p3 = scmp.lt.u32.totalorder %s3392_s25, %s4204_s6 }
  0x2c   :  { %p3398_p4 = pnand %p3396_p3, %p3393_p2 }
  0x2e   :  { %3401 = shalt.err (!%p3398_p4)
}
  0x2f   :  { %s3402_s4 = scalar_lea.vmem %s94_s18, 512  ;;  %p3407_p6 = scmp.lt.s32.totalorder %s94_s18, %s94_s18 }
  0x30   :  { %p3403_p5 = scmp.ne.s32.totalorder %s94_s18, %s3402_s4  ;;  %p3408_p7 = scmp.lt.s32.totalorder %s3402_s4, %s3402_s4 }
  0x32   :  { %p3409_p8 = por %p3408_p7, %p3407_p6 }
  0x34   :  { %p3410_p9 = pnand %p3409_p8, %p3403_p5 }
  0x36   :  { %3413 = shalt.err (!%p3410_p9)
}
  0x37   :  { %99 = dma.hbm_to_vmem [thread:$0]  %s4204_s6, 512, %s94_s18, [#allocation12], %s3606_s20, %s3606_s20, %s3607_s21  }
  0x38   :  { %s3414_s26 = scalar_lea.hbm %s4198_s0, 256 }
  0x39   :  { %p3415_p10 = scmp.ne.s32.totalorder %s4198_s0, %s3414_s26  ;;  %p3418_p11 = scmp.lt.u32.totalorder %s3414_s26, %s4198_s0 }
  0x3b   :  { %p3420_p12 = pnand %p3418_p11, %p3415_p10 }
  0x3d   :  { %3423 = shalt.err (!%p3420_p12)
}
  0x3e   :  { %s3424_s25 = scalar_lea.vmem %s3731_s22, 256  ;;  %p3429_p0 = scmp.lt.s32.totalorder %s3731_s22, %s3731_s22 }
  0x3f   :  { %p3425_p13 = scmp.ne.s32.totalorder %s3731_s22, %s3424_s25  ;;  %p3430_p1 = scmp.lt.s32.totalorder %s3424_s25, %s3424_s25 }
  0x41   :  { %p3431_p2 = por %p3430_p1, %p3429_p0 }
  0x43   :  { %p3432_p3 = pnand %p3431_p2, %p3425_p13 }
  0x45   :  { %3435 = shalt.err (!%p3432_p3)
}
  0x46   :  { %37 = dma.hbm_to_vmem [thread:$0]  %s4198_s0, 256, %s3731_s22, [#allocation3], %s3606_s20, %s3606_s20, %s3607_s21  }
  0x47   :  { %s3610_s27 = smov [#allocation7]   ;;  %s3611_s30 = smov [#allocation10]  }
  0x48   :  { %s57_s29 = sshll.u32 %s3610_s27, 4  ;;  %s81_s14 = sshll.u32 %s3611_s30, 4  ;;  %s58_s29 = int_to_ptr.vmem [resolvable:$true] %s57_s29  ;;  %s3768_s14 = int_to_ptr.vmem [resolvable:$true] %s81_s14 }
  0x49   :  { %s3436_s15 = scalar_lea.hbm %s4201_s3, 256 }
  0x4a   :  { %p3437_p4 = scmp.ne.s32.totalorder %s4201_s3, %s3436_s15  ;;  %p3440_p5 = scmp.lt.u32.totalorder %s3436_s15, %s4201_s3 }
  0x4c   :  { %p3442_p6 = pnand %p3440_p5, %p3437_p4 }
  0x4e   :  { %3445 = shalt.err (!%p3442_p6)
}
  0x4f   :  { %s3446_s0 = scalar_lea.vmem %s58_s29, 256  ;;  %p3451_p8 = scmp.lt.s32.totalorder %s58_s29, %s58_s29 }
  0x50   :  { %p3447_p7 = scmp.ne.s32.totalorder %s58_s29, %s3446_s0  ;;  %p3452_p9 = scmp.lt.s32.totalorder %s3446_s0, %s3446_s0 }
  0x52   :  { %p3453_p10 = por %p3452_p9, %p3451_p8 }
  0x54   :  { %p3454_p11 = pnand %p3453_p10, %p3447_p7 }
  0x56   :  { %3457 = shalt.err (!%p3454_p11)
}
  0x57   :  { %63 = dma.hbm_to_vmem [thread:$0]  %s4201_s3, 256, %s58_s29, [#allocation6], %s3606_s20, %s3606_s20, %s3607_s21  }
  0x58   :  { %s3458_s25 = scalar_lea.hbm %s4203_s5, 512 }
  0x59   :  { %p3459_p12 = scmp.ne.s32.totalorder %s4203_s5, %s3458_s25  ;;  %p3462_p13 = scmp.lt.u32.totalorder %s3458_s25, %s4203_s5 }
  0x5b   :  { %p3464_p0 = pnand %p3462_p13, %p3459_p12 }
  0x5d   :  { %3467 = shalt.err (!%p3464_p0)
}
  0x5e   :  { %s3468_s4 = scalar_lea.vmem %s3768_s14, 512  ;;  %p3473_p2 = scmp.lt.s32.totalorder %s3768_s14, %s3768_s14 }
  0x5f   :  { %p3469_p1 = scmp.ne.s32.totalorder %s3768_s14, %s3468_s4  ;;  %p3474_p3 = scmp.lt.s32.totalorder %s3468_s4, %s3468_s4 }
  0x61   :  { %p3475_p4 = por %p3474_p3, %p3473_p2 }
  0x63   :  { %p3476_p5 = pnand %p3475_p4, %p3469_p1 }
  0x65   :  { %3479 = shalt.err (!%p3476_p5)
}
  0x66   :  { %87 = dma.hbm_to_vmem [thread:$0]  %s4203_s5, 512, %s3768_s14, [#allocation9], %s3606_s20, %s3606_s20, %s3607_s21  }
  0x67   :  { %s3612_s28 = smov [#allocation13]   ;;  %s3613_s16 = smov [#allocation14]  }
  0x68   :  { %s106_s15 = sshll.u32 %s3612_s28, 4  ;;  %s116_s2 = sshll.u32 %s3613_s16, 4  ;;  %s107_s15 = int_to_ptr.vmem [resolvable:$true] %s106_s15  ;;  %s117_s2 = int_to_ptr.vmem [resolvable:$true] %s116_s2 }
  0x69   :  { %s3480_s0 = scalar_lea.hbm %s4205_s7, 16 }
  0x6a   :  { %p3481_p6 = scmp.ne.s32.totalorder %s4205_s7, %s3480_s0  ;;  %p3484_p7 = scmp.lt.u32.totalorder %s3480_s0, %s4205_s7 }
  0x6c   :  { %p3486_p8 = pnand %p3484_p7, %p3481_p6 }
  0x6e   :  { %3489 = shalt.err (!%p3486_p8)
}
  0x6f   :  { %s3490_s5 = scalar_lea.vmem %s107_s15, 16  ;;  %s3494_s14 = scalar_lea.vmem %s107_s15, 32 }
  0x70   :  { %p3491_p9 = scmp.ne.s32.totalorder %s107_s15, %s3490_s5  ;;  %p3495_p10 = scmp.lt.s32.totalorder %s107_s15, %s107_s15 }
  0x71   :  { %p3496_p11 = scmp.lt.s32.totalorder %s3494_s14, %s3490_s5 }
  0x73   :  { %p3497_p12 = por %p3496_p11, %p3495_p10 }
  0x75   :  { %p3498_p13 = pnand %p3497_p12, %p3491_p9 }
  0x77   :  { %3501 = shalt.err (!%p3498_p13)
}
  0x78   :  { %109 = dma.hbm_to_vmem [thread:$0]  %s4205_s7, 16, %s107_s15, [#allocation12]  }
  0x79   :  { %s3502_s30 = scalar_lea.hbm %s4206_s8, 16 }
  0x7a   :  { %p3503_p0 = scmp.ne.s32.totalorder %s4206_s8, %s3502_s30  ;;  %p3506_p1 = scmp.lt.u32.totalorder %s3502_s30, %s4206_s8 }
  0x7c   :  { %p3508_p2 = pnand %p3506_p1, %p3503_p0 }
  0x7e   :  { %3511 = shalt.err (!%p3508_p2)
}
  0x7f   :  { %s3512_s16 = scalar_lea.vmem %s117_s2, 16  ;;  %s3516_s26 = scalar_lea.vmem %s117_s2, 32 }
  0x80   :  { %p3513_p3 = scmp.ne.s32.totalorder %s117_s2, %s3512_s16  ;;  %p3517_p4 = scmp.lt.s32.totalorder %s117_s2, %s117_s2 }
  0x81   :  { %p3518_p5 = scmp.lt.s32.totalorder %s3516_s26, %s3512_s16 }
  0x83   :  { %p3519_p6 = por %p3518_p5, %p3517_p4 }
  0x85   :  { %p3520_p7 = pnand %p3519_p6, %p3513_p3 }
  0x87   :  { %3523 = shalt.err (!%p3520_p7)
}
  0x88   :  { %119 = dma.hbm_to_vmem [thread:$0]  %s4206_s8, 16, %s117_s2, [#allocation15]  }
  0x89   :  { %3590 = dma.done.wait [#allocation3], 256  }
  0x8a   :  { %3591 = vsyncadd [#allocation3], 4294967040 }
  0x8b   :  { %3592 = dma.done.wait [#allocation6], 512  }
  0x8c   :  { %3593 = vsyncadd [#allocation6], 4294966784 }
  0x8d   :  { %3594 = dma.done.wait [#allocation9], 1024  }
  0x8e   :  { %3595 = vsyncadd [#allocation9], 4294966272 }
  0x8f   :  { %3596 = dma.done.wait [#allocation12], 528  }
  0x90   :  { %3597 = vsyncadd [#allocation12], 4294966768 }
  0x91   :  { %3598 = dma.done.wait [#allocation15], 16  }
  0x92   :  { %3599 = vsyncadd [#allocation15], 4294967280  ;;  %v3614_v0 = vmov 0.0|0.0   ;;  %vm3615_vm0 = vmmov 0   ;;  %v3616_v1 = vmov 0.0   ;;  %vm165_vm1 = vcmask 130048  }
  0x93   :  { %3077 = vmatprep.subr.bf16.mxu0 %v3614_v0  ;;  %2855 = vmatprep.mubr.msk.f32.mxu0 %vm3615_vm0, %v3616_v1  ;;  %v163_v2 = vld [vmem:[#allocation5] sm:$0xff]  ;;  %v164_v3 = vld [vmem:[#allocation5 + $0x8] sm:$0xff]  ;;  %v161_v4 = vld [vmem:[#allocation2] sm:$0xff]  ;;  %s3618_s17 = smov 96   ;;  %s3619_s0 = smov 32   ;;  %vm372_vm2 = vcmask 261120  }
  0x94   :  { %v3034_v5 = vpack.c.bf16 %v164_v3, %v163_v2  ;;  %2771 = vmatprep.mubr.msk.f32.mxu1 %vm165_vm1, %v161_v4  ;;  %v248_v6 = vld [vmem:[#allocation7] sm:$0xff]  ;;  %v249_v7 = vld [vmem:[#allocation7 + $0x8] sm:$0xff]  ;;  %v2600_v13 = vld [vmem:[#allocation13] ss:$0 sm:$0xff]  ;;  %vm2417_vm3 = vcmask 1041408   ;;  %vm2419_vm4 = vcmask 1043456  }
  0x95   :  { %v162_v8 = vld [vmem:[#allocation2 + $0x8] sm:$0xff]  ;;  %v3039_v9 = vpack.c.bf16 %v249_v7, %v248_v6  ;;  %v247_v10 = vld [vmem:[%s4199_s1] sm:$0x3]  ;;  %s3617_s1 = smov 64   ;;  %v152_v35 = vld [vmem:[#allocation10] sm:$0xff]  ;;  %vm2421_vm5 = vcmask 1045504  }
  0x96   :  { %3035 = vmatprep.subr.bf16.mxu1 %v3034_v5  ;;  %v153_v36 = vld [vmem:[#allocation10 + $0x8] sm:$0xff]  ;;  %v154_v37 = vld [vmem:[#allocation10 + $0x10] sm:$0xff]  ;;  %v155_v39 = vld [vmem:[#allocation10 + $0x18] sm:$0xff]  ;;  %vm2527_vm6 = vcmask 261126   ;;  %vm2533_vm7 = vcmask 254976  }
  0x97   :  { %3037 = vmatpush3.bf16.msra.mxu1 %v3034_v5  ;;  %v3859_v38 = vpack.c.bf16 %v153_v36, %v152_v35  ;;  %v3862_v40 = vpack.c.bf16 %v155_v39, %v154_v37  ;;  %v148_v45 = vld [vmem:[#allocation8] sm:$0xff]  ;;  %v149_v46 = vld [vmem:[#allocation8 + $0x8] sm:$0xff]  ;;  %v150_v48 = vld [vmem:[#allocation8 + $0x10] sm:$0xff] }
  0x98   :  { %3038 = vmatprep.subr.bf16.mxu1 %v3614_v0  ;;  %v3874_v47 = vpack.c.bf16 %v149_v46, %v148_v45  ;;  %v151_v49 = vld [vmem:[#allocation8 + $0x18] sm:$0xff] }
  0x99   :  { %3079 = vmatpush3.bf16.msra.mxu0 %v3859_v38  ;;  %v3878_v51 = vpack.c.bf16 %v151_v49, %v150_v48 }
  0x9a   :  { %2772 = vmatmul.mubr.msk.f32.vlgmr.msra.gmra.mrb[0].mxu1 %vm165_vm1, %v162_v8  ;;  %3080 = vmatprep.subr.bf16.mxu0 %v3614_v0 }
  0x9b   :  { %3040 = vmatpush3.bf16.msra.mxu1 %v3039_v9  ;;  %2778 = vmatprep.mubr.msk.f32.mxu1 %vm3615_vm0, %v3616_v1 }
  0x9c   :  { %3041 = vmatprep.subr.bf16.mxu1 %v3614_v0 }
  0x9d   :  { %3082 = vmatpush3.bf16.msra.mxu0 %v3862_v40 }
  0x9e   :  { %2779 = vmatmul.mubr.msk.f32.vlgmr.msra.gmra.mrb[2].mxu1 %vm165_vm1, %v247_v10  ;;  %3089 = vmatprep.subr.bf16.mxu0 %v3614_v0 }
  0x9f   :  { %2789 = vmatprep.mubr.msk.f32.mxu1 %vm3615_vm0, %v3616_v1  ;;  %3043 = vmatpush3.bf16.msra.mxu1 %v3859_v38 }
  0xa0   :  { %3044 = vmatprep.subr.bf16.mxu1 %v3614_v0 }
  0xa3   :  { %3046 = vmatpush3.bf16.msra.mxu1 %v3862_v40 }
  0xa4   :  { %3047 = vmatprep.subr.bf16.mxu1 %v3614_v0 }
 0x16d   :  { %v2773_v11 = vpop.f32.mrb[0].mxu1 }
 0x16e   :  { %v238_v12 = vpop.f32.mrb[1].mxu1 }
 0x171   :  { %v326_v14 = vpop.f32.mrb[2].mxu1 }
 0x172   :  { %v327_v15 = vadd.f32 %v2600_v13, %v326_v14  ;;  %v2780_v16 = vpop.f32.mrb[3].mxu1 }
 0x174   :  { %v330_v17 = vadd.f32 %v327_v15, %v238_v12  ;;  %v332_v18 = vrot.slane %v327_v15, 6  ;;  %v335_v19 = vrot.slane %v327_v15, 4  ;;  %v338_v20 = vrot.slane %v327_v15, 2 }
 0x175   :  { %v3844_v21 = vadd.f32 %v2773_v11, %v327_v15 }
 0x176   :  { %3220 = vtanh.f32 %v330_v17  ;;  %v3846_v22 = vadd.f32 %v332_v18, %v238_v12  ;;  %v3848_v23 = vadd.f32 %v335_v19, %v238_v12  ;;  %v3850_v24 = vadd.f32 %v338_v20, %v238_v12 }
 0x177   :  { %v3852_v25 = vadd.f32 %v2773_v11, %v332_v18  ;;  %v3854_v26 = vadd.f32 %v2773_v11, %v335_v19  ;;  %v3856_v27 = vadd.f32 %v2773_v11, %v338_v20  ;;  %v2602_v29 = vmul.f32 -1.442695, %v330_v17 }
 0x179   :  { %3222 = vpow2.f32 %v2602_v29 }
 0x180   :  { %v3221_v28 = vpop.eup %3220 }
 0x181   :  { %353 = vrot.lane.b32.xlu0 %v3221_v28, %s3617_s1 }
 0x183   :  { %v3223_v30 = vpop.eup %3222 }
 0x184   :  { %v348_v31 = vadd.f32 1.0, %v3223_v30 }
 0x186   :  { %3224 = vrcp.f32 %v348_v31 }
 0x190   :  { %v3225_v32 = vpop.eup %3224 }
 0x1f3   :  { %v354_v33 = vpop.permute.xlu0 %353 }
 0x1f4   :  { %v356_v34 = vmul.f32 %v3225_v32, %v354_v33 }
 0x1f6   :  { %3226 = vtanh.f32 %v356_v34  ;;  %v527_v42 = vrot.slane %v356_v34, 6 }
 0x200   :  { %v3227_v41 = vpop.eup %3226 }
 0x201   :  { %359 = vrot.lane.b32.xlu0 %v3227_v41, %s3618_s17 }
 0x205   :  { %528 = vrot.lane.b32.xlu0 %v527_v42, %s3619_s0 }
 0x273   :  { %v360_v43 = vpop.permute.xlu0 %359 }
 0x274   :  { %v362_v44 = vmul.f32 %v3225_v32, %v360_v43 }
 0x276   :  { %370 = vrot.lane.b32.xlu1 %v362_v44, %s3619_s0 }
 0x277   :  { %v529_v3 = vpop.permute.xlu0 %528 }
 0x2e8   :  { %v371_v50 = vpop.permute.xlu1 %370 }
 0x2e9   :  { %2790 = vmatmul.mubr.msk.f32.vlgmr.msra.gmra.mrb[4].mxu1 %vm372_vm2, %v371_v50 }
 0x2ea   :  { %3049 = vmatpush3.bf16.msra.mxu1 %v3874_v47  ;;  %2800 = vmatprep.mubr.msk.f32.mxu1 %vm3615_vm0, %v3616_v1 }
 0x2eb   :  { %3050 = vmatprep.subr.bf16.mxu1 %v3614_v0 }
 0x2ee   :  { %3052 = vmatpush3.bf16.msra.mxu1 %v3878_v51 }
 0x2ef   :  { %3053 = vmatprep.subr.bf16.mxu1 %v3614_v0 }
 0x2f1   :  { %2801 = vmatmul.mubr.msk.f32.vlgmr.msra.gmra.mrb[6].mxu1 %vm372_vm2, %v371_v50 }
 0x2f2   :  { %3055 = vmatpush3.bf16.msra.mxu1 %v3859_v38  ;;  %2811 = vmatprep.mubr.msk.f32.mxu1 %vm3615_vm0, %v3616_v1 }
 0x2f3   :  { %3056 = vmatprep.subr.bf16.mxu1 %v3614_v0 }
 0x2f6   :  { %3058 = vmatpush3.bf16.msra.mxu1 %v3862_v40 }
 0x2f7   :  { %3059 = vmatprep.subr.bf16.mxu1 %v3614_v0 }
 0x3bc   :  { %v3892_v52 = vpop.f32.mrb[4].mxu1 }
 0x3bd   :  { %v2791_v53 = vpop.f32.mrb[5].mxu1 }
 0x3c4   :  { %v511_v54 = vpop.f32.mrb[6].mxu1 }
 0x3c5   :  { %v516_v55 = vrot.slane %v511_v54, 6  ;;  %v2802_v56 = vpop.f32.mrb[7].mxu1 }
 0x3c7   :  { %v518_v57 = vadd.f32 %v516_v55, %v3846_v22 }
 0x3c9   :  { %3228 = vtanh.f32 %v518_v57  ;;  %v2606_v59 = vmul.f32 -1.442695, %v518_v57 }
 0x3cb   :  { %3230 = vpow2.f32 %v2606_v59 }
 0x3d3   :  { %v3229_v58 = vpop.eup %3228 }
 0x3d4   :  { %533 = vrot.lane.b32.xlu1 %v3229_v58, %s3617_s1 }
 0x3d5   :  { %v3231_v60 = vpop.eup %3230 }
 0x3d6   :  { %v522_v61 = vadd.f32 1.0, %v3231_v60 }
 0x3d8   :  { %3232 = vrcp.f32 %v522_v61 }
 0x3e2   :  { %v3233_v62 = vpop.eup %3232 }
 0x3e3   :  { %v531_v4 = vmul.f32 %v3233_v62, %v529_v3 }
 0x446   :  { %v534_v63 = vpop.permute.xlu1 %533 }
 0x447   :  { %v536_v2 = vmul.f32 %v3233_v62, %v534_v63 }
 0x449   :  { %538 = vrot.lane.b32.xlu1 %v536_v2, %s3619_s0 }
 0x4bb   :  { %v539_v5 = vpop.permute.xlu1 %538 }
 0x4bc   :  { %v541_v6 = vadd.f32 %v539_v5, %v531_v4 }
 0x4be   :  { %3234 = vtanh.f32 %v541_v6  ;;  %v706_v31 = vrot.slane %v541_v6, 6 }
 0x4c8   :  { %v3235_v7 = vpop.eup %3234 }
 0x4c9   :  { %544 = vrot.lane.b32.xlu0 %v3235_v7, %s3617_s1 }
 0x53b   :  { %v545_v8 = vpop.permute.xlu0 %544 }
 0x53c   :  { %v547_v9 = vmul.f32 %v3233_v62, %v545_v8 }
 0x53e   :  { %v549_v10 = vrot.slane %v547_v9, 2 }
 0x540   :  { %550 = vrot.lane.b32.xlu1 %v549_v10, %s3619_s0 }
 0x5b2   :  { %v551_v11 = vpop.permute.xlu1 %550 }
 0x5b3   :  { %2812 = vmatmul.mubr.msk.f32.vlgmr.msra.gmra.mrb[8].mxu1 %vm372_vm2, %v551_v11 }
 0x5b4   :  { %3061 = vmatpush3.bf16.msra.mxu1 %v3874_v47  ;;  %2822 = vmatprep.mubr.msk.f32.mxu1 %vm3615_vm0, %v3616_v1 }
 0x5b5   :  { %3062 = vmatprep.subr.bf16.mxu1 %v3614_v0 }
 0x5b8   :  { %3064 = vmatpush3.bf16.msra.mxu1 %v3878_v51 }
 0x5b9   :  { %3065 = vmatprep.subr.bf16.mxu1 %v3614_v0 }
 0x5bb   :  { %2823 = vmatmul.mubr.msk.f32.vlgmr.msra.gmra.mrb[10].mxu1 %vm372_vm2, %v551_v11 }
 0x5bc   :  { %3067 = vmatpush3.bf16.msra.mxu1 %v3859_v38  ;;  %2833 = vmatprep.mubr.msk.f32.mxu1 %vm3615_vm0, %v3616_v1 }
 0x5bd   :  { %3068 = vmatprep.subr.bf16.mxu1 %v3614_v0 }
 0x5c0   :  { %3070 = vmatpush3.bf16.msra.mxu1 %v3862_v40 }
 0x5c1   :  { %3071 = vmatprep.subr.bf16.mxu1 %v3614_v0 }
 0x686   :  { %v3913_v12 = vpop.f32.mrb[8].mxu1 }
 0x687   :  { %v2813_v13 = vpop.f32.mrb[9].mxu1 }
 0x68e   :  { %v690_v14 = vpop.f32.mrb[10].mxu1 }
 0x68f   :  { %v695_v15 = vrot.slane %v690_v14, 4  ;;  %v2824_v16 = vpop.f32.mrb[11].mxu1 }
 0x691   :  { %v697_v17 = vadd.f32 %v695_v15, %v3848_v23 }
 0x693   :  { %3236 = vtanh.f32 %v697_v17  ;;  %v2609_v19 = vmul.f32 -1.442695, %v697_v17 }
 0x695   :  { %3238 = vpow2.f32 %v2609_v19 }
 0x69d   :  { %v3237_v18 = vpop.eup %3236 }
 0x69e   :  { %710 = vrot.lane.b32.xlu0 %v3237_v18, %s3617_s1 }
 0x69f   :  { %v3239_v20 = vpop.eup %3238 }
 0x6a0   :  { %v701_v22 = vadd.f32 1.0, %v3239_v20 }
 0x6a2   :  { %3240 = vrcp.f32 %v701_v22 }
 0x6ac   :  { %v3241_v28 = vpop.eup %3240 }
 0x6ad   :  { %v708_v32 = vmul.f32 %v3241_v28, %v706_v31 }
 0x710   :  { %v711_v29 = vpop.permute.xlu0 %710 }
 0x711   :  { %v713_v30 = vmul.f32 %v3241_v28, %v711_v29 }
 0x713   :  { %715 = vrot.lane.b32.xlu1 %v713_v30, %s3619_s0 }
 0x785   :  { %v716_v33 = vpop.permute.xlu1 %715 }
 0x786   :  { %v718_v34 = vadd.f32 %v716_v33, %v708_v32 }
 0x788   :  { %3242 = vtanh.f32 %v718_v34  ;;  %v883_v57 = vrot.slane %v718_v34, 6 }
 0x792   :  { %v3243_v23 = vpop.eup %3242 }
 0x793   :  { %721 = vrot.lane.b32.xlu0 %v3243_v23, %s3617_s1 }
 0x805   :  { %v722_v35 = vpop.permute.xlu0 %721 }
 0x806   :  { %v724_v36 = vmul.f32 %v3241_v28, %v722_v35 }
 0x808   :  { %v726_v37 = vrot.slane %v724_v36, 4 }
 0x80a   :  { %727 = vrot.lane.b32.xlu1 %v726_v37, %s3619_s0 }
 0x87c   :  { %v728_v39 = vpop.permute.xlu1 %727 }
 0x87d   :  { %2834 = vmatmul.mubr.msk.f32.vlgmr.msra.gmra.mrb[12].mxu1 %vm372_vm2, %v728_v39 }
 0x87e   :  { %3073 = vmatpush3.bf16.msra.mxu1 %v3874_v47  ;;  %2844 = vmatprep.mubr.msk.f32.mxu1 %vm3615_vm0, %v3616_v1 }
 0x87f   :  { %3074 = vmatprep.subr.bf16.mxu1 %v3614_v0 }
 0x882   :  { %3076 = vmatpush3.bf16.msra.mxu1 %v3878_v51 }
 0x883   :  { %3083 = vmatprep.subr.bf16.mxu1 %v3614_v0 }
 0x885   :  { %2845 = vmatmul.mubr.msk.f32.vlgmr.msra.gmra.mrb[14].mxu1 %vm372_vm2, %v728_v39 }
 0x886   :  { %3085 = vmatpush3.bf16.msra.mxu1 %v3874_v47  ;;  %2866 = vmatprep.mubr.msk.f32.mxu1 %vm3615_vm0, %v3616_v1 }
 0x887   :  { %3086 = vmatprep.subr.bf16.mxu1 %v3614_v0 }
 0x88a   :  { %3088 = vmatpush3.bf16.msra.mxu1 %v3878_v51 }
 0x88b   :  { %3095 = vmatprep.subr.bf16.mxu1 %v3614_v0 }
 0x950   :  { %v3934_v41 = vpop.f32.mrb[12].mxu1 }
 0x951   :  { %v2835_v42 = vpop.f32.mrb[13].mxu1 }
 0x958   :  { %v867_v43 = vpop.f32.mrb[14].mxu1 }
 0x959   :  { %v872_v44 = vrot.slane %v867_v43, 2  ;;  %v2846_v45 = vpop.f32.mrb[15].mxu1 }
 0x95b   :  { %v874_v46 = vadd.f32 %v872_v44, %v3850_v24 }
 0x95d   :  { %3244 = vtanh.f32 %v874_v46  ;;  %v2612_v49 = vmul.f32 -1.442695, %v874_v46 }
 0x95f   :  { %3246 = vpow2.f32 %v2612_v49 }
 0x967   :  { %v3245_v48 = vpop.eup %3244 }
 0x968   :  { %887 = vrot.lane.b32.xlu0 %v3245_v48, %s3617_s1 }
 0x969   :  { %v3247_v50 = vpop.eup %3246 }
 0x96a   :  { %v878_v53 = vadd.f32 1.0, %v3247_v50 }
 0x96c   :  { %3248 = vrcp.f32 %v878_v53 }
 0x976   :  { %v3249_v54 = vpop.eup %3248 }
 0x977   :  { %v885_v58 = vmul.f32 %v3249_v54, %v883_v57 }
 0x9da   :  { %v888_v55 = vpop.permute.xlu0 %887 }
 0x9db   :  { %v890_v56 = vmul.f32 %v3249_v54, %v888_v55 }
 0x9dd   :  { %892 = vrot.lane.b32.xlu1 %v890_v56, %s3619_s0 }
 0xa4f   :  { %v893_v59 = vpop.permute.xlu1 %892 }
 0xa50   :  { %v895_v60 = vadd.f32 %v893_v59, %v885_v58 }
 0xa52   :  { %3250 = vtanh.f32 %v895_v60  ;;  %v1057_v14 = vrot.slane %v895_v60, 6 }
 0xa5c   :  { %v3251_v24 = vpop.eup %3250 }
 0xa5d   :  { %898 = vrot.lane.b32.xlu0 %v3251_v24, %s3617_s1 }
 0xacf   :  { %v899_v61 = vpop.permute.xlu0 %898 }
 0xad0   :  { %v901_v62 = vmul.f32 %v3249_v54, %v899_v61 }
 0xad2   :  { %v903_v63 = vrot.slane %v901_v62, 6 }
 0xad4   :  { %904 = vrot.lane.b32.xlu1 %v903_v63, %s3619_s0 }
 0xb46   :  { %v905_v2 = vpop.permute.xlu1 %904 }
 0xb47   :  { %2856 = vmatmul.mubr.msk.f32.vlgmr.msra.gmra.mrb[0].mxu0 %vm372_vm2, %v905_v2  ;;  %2867 = vmatmul.mubr.msk.f32.vlgmr.msra.gmra.mrb[16].mxu1 %vm372_vm2, %v905_v2 }
 0xb48   :  { %3091 = vmatpush3.bf16.msra.mxu0 %v3859_v38  ;;  %3097 = vmatpush3.bf16.msra.mxu1 %v3874_v47 }
 0xb49   :  { %3092 = vmatprep.subr.bf16.mxu0 %v3614_v0  ;;  %3098 = vmatprep.subr.bf16.mxu1 %v3614_v0 }
 0xb4a   :  { %2877 = vmatprep.mubr.msk.f32.mxu0 %vm3615_vm0, %v3616_v1  ;;  %2888 = vmatprep.mubr.msk.f32.mxu1 %vm3615_vm0, %v3616_v1 }
 0xb4c   :  { %3094 = vmatpush3.bf16.msra.mxu0 %v3862_v40  ;;  %3100 = vmatpush3.bf16.msra.mxu1 %v3878_v51 }
 0xb4d   :  { %3101 = vmatprep.subr.bf16.mxu0 %v3614_v0  ;;  %3107 = vmatprep.subr.bf16.mxu1 %v3614_v0 }
 0xc1a   :  { %v1044_v3 = vpop.f32.mrb[16].mxu1 }
 0xc1b   :  { %v1048_v4 = vadd.f32 %v1044_v3, %v3844_v21  ;;  %v2868_v5 = vpop.f32.mrb[17].mxu1 }
 0xc1d   :  { %3252 = vtanh.f32 %v1048_v4  ;;  %v2615_v7 = vmul.f32 -1.442695, %v1048_v4 }
 0xc1f   :  { %3254 = vpow2.f32 %v2615_v7 }
 0xc27   :  { %v3253_v6 = vpop.eup %3252 }
 0xc28   :  { %1061 = vrot.lane.b32.xlu0 %v3253_v6, %s3617_s1 }
 0xc29   :  { %v3255_v8 = vpop.eup %3254 }
 0xc2a   :  { %v1052_v9 = vadd.f32 1.0, %v3255_v8  ;;  %v4005_v8 = vld [vmem:[#allocation14] ss:$0 sm:$0xff] }
 0xc2c   :  { %3256 = vrcp.f32 %v1052_v9 }
 0xc36   :  { %v3257_v10 = vpop.eup %3256 }
 0xc37   :  { %v1059_v15 = vmul.f32 %v3257_v10, %v1057_v14 }
 0xc9a   :  { %v1062_v11 = vpop.permute.xlu0 %1061 }
 0xc9b   :  { %v1064_v13 = vmul.f32 %v3257_v10, %v1062_v11 }
 0xc9d   :  { %1066 = vrot.lane.b32.xlu1 %v1064_v13, %s3619_s0 }
 0xd0f   :  { %v1067_v16 = vpop.permute.xlu1 %1066 }
 0xd10   :  { %v1069_v17 = vadd.f32 %v1067_v16, %v1059_v15 }
 0xd12   :  { %3258 = vtanh.f32 %v1069_v17  ;;  %v1233_v37 = vrot.slane %v1069_v17, 6 }
 0xd1c   :  { %v3259_v21 = vpop.eup %3258 }
 0xd1d   :  { %1072 = vrot.lane.b32.xlu0 %v3259_v21, %s3617_s1 }
 0xd8f   :  { %v1073_v18 = vpop.permute.xlu0 %1072 }
 0xd90   :  { %v1075_v19 = vmul.f32 %v3257_v10, %v1073_v18  ;;  %v442_v10 = vadd.f32 %v4005_v8, %v3892_v52 }
 0xd92   :  { %1077 = vrot.lane.b32.xlu1 %v1075_v19, %s3619_s0  ;;  %v2626_v13 = vmul.f32 -1.442695, %v442_v10 }
 0xe04   :  { %v1078_v20 = vpop.permute.xlu1 %1077 }
 0xe05   :  { %2878 = vmatmul.mubr.msk.f32.vlgmr.msra.gmra.mrb[2].mxu0 %vm372_vm2, %v1078_v20  ;;  %2889 = vmatmul.mubr.msk.f32.vlgmr.msra.gmra.mrb[18].mxu1 %vm372_vm2, %v1078_v20 }
 0xe06   :  { %3103 = vmatpush3.bf16.msra.mxu0 %v3859_v38  ;;  %3109 = vmatpush3.bf16.msra.mxu1 %v3874_v47 }
 0xe07   :  { %3104 = vmatprep.subr.bf16.mxu0 %v3614_v0  ;;  %3110 = vmatprep.subr.bf16.mxu1 %v3614_v0 }
 0xe08   :  { %2899 = vmatprep.mubr.msk.f32.mxu0 %vm3615_vm0, %v3616_v1  ;;  %2910 = vmatprep.mubr.msk.f32.mxu1 %vm3615_vm0, %v3616_v1 }
 0xe0a   :  { %3106 = vmatpush3.bf16.msra.mxu0 %v3862_v40  ;;  %3112 = vmatpush3.bf16.msra.mxu1 %v3878_v51 }
 0xe0b   :  { %3113 = vmatprep.subr.bf16.mxu0 %v3614_v0  ;;  %3119 = vmatprep.subr.bf16.mxu1 %v3614_v0 }
 0xed8   :  { %v1217_v22 = vpop.f32.mrb[18].mxu1 }
 0xed9   :  { %v1222_v28 = vrot.slane %v1217_v22, 6  ;;  %v2890_v29 = vpop.f32.mrb[19].mxu1 }
 0xedb   :  { %v1224_v30 = vadd.f32 %v1222_v28, %v3852_v25 }
 0xedd   :  { %3260 = vtanh.f32 %v1224_v30  ;;  %v2618_v32 = vmul.f32 -1.442695, %v1224_v30 }
 0xedf   :  { %3262 = vpow2.f32 %v2618_v32 }
 0xee7   :  { %v3261_v31 = vpop.eup %3260 }
 0xee8   :  { %1237 = vrot.lane.b32.xlu0 %v3261_v31, %s3617_s1 }
 0xee9   :  { %v3263_v33 = vpop.eup %3262 }
 0xeea   :  { %v1228_v34 = vadd.f32 1.0, %v3263_v33 }
 0xeec   :  { %3264 = vrcp.f32 %v1228_v34 }
 0xef6   :  { %v3265_v23 = vpop.eup %3264 }
 0xef7   :  { %v1235_v39 = vmul.f32 %v3265_v23, %v1233_v37  ;;  %v156_v37 = vld [vmem:[#allocation11] sm:$0xff] }
 0xf5a   :  { %v1238_v35 = vpop.permute.xlu0 %1237 }
 0xf5b   :  { %v1240_v36 = vmul.f32 %v3265_v23, %v1238_v35 }
 0xf5d   :  { %1242 = vrot.lane.b32.xlu1 %v1240_v36, %s3619_s0 }
 0xfcf   :  { %v1243_v42 = vpop.permute.xlu1 %1242 }
 0xfd0   :  { %v1245_v43 = vadd.f32 %v1243_v42, %v1235_v39  ;;  %v157_v39 = vld [vmem:[#allocation11 + $0x8] sm:$0xff] }
 0xfd1   :  { %v4027_v42 = vpack.c.bf16 %v157_v39, %v156_v37 }
 0xfd2   :  { %3266 = vtanh.f32 %v1245_v43 }
 0xfdc   :  { %v3267_v25 = vpop.eup %3266 }
 0xfdd   :  { %1248 = vrot.lane.b32.xlu0 %v3267_v25, %s3617_s1  ;;  %v159_v25 = vld [vmem:[#allocation11 + $0x18] sm:$0xff] }
0x104f   :  { %v1249_v44 = vpop.permute.xlu0 %1248 }
0x1050   :  { %v1251_v45 = vmul.f32 %v3265_v23, %v1249_v44 }
0x1052   :  { %v1253_v46 = vrot.slane %v1251_v45, 2 }
0x1054   :  { %1254 = vrot.lane.b32.xlu1 %v1253_v46, %s3619_s0 }
0x10c6   :  { %v1255_v48 = vpop.permute.xlu1 %1254 }
0x10c7   :  { %2900 = vmatmul.mubr.msk.f32.vlgmr.msra.gmra.mrb[4].mxu0 %vm372_vm2, %v1255_v48  ;;  %2911 = vmatmul.mubr.msk.f32.vlgmr.msra.gmra.mrb[20].mxu1 %vm372_vm2, %v1255_v48  ;;  %v621_v48 = vadd.f32 %v4005_v8, %v3913_v12 }
0x10c8   :  { %3115 = vmatpush3.bf16.msra.mxu0 %v3859_v38  ;;  %3121 = vmatpush3.bf16.msra.mxu1 %v3874_v47 }
0x10c9   :  { %3116 = vmatprep.subr.bf16.mxu0 %v3614_v0  ;;  %3122 = vmatprep.subr.bf16.mxu1 %v3614_v0 }
0x10ca   :  { %2921 = vmatprep.mubr.msk.f32.mxu0 %vm3615_vm0, %v3616_v1  ;;  %2932 = vmatprep.mubr.msk.f32.mxu1 %vm3615_vm0, %v3616_v1 }
0x10cc   :  { %3118 = vmatpush3.bf16.msra.mxu0 %v3862_v40  ;;  %3124 = vmatpush3.bf16.msra.mxu1 %v3878_v51  ;;  %v1410_v51 = vrot.slane %v1245_v43, 6  ;;  %v158_v43 = vld [vmem:[#allocation11 + $0x10] sm:$0xff] }
0x10cd   :  { %3125 = vmatprep.subr.bf16.mxu0 %v3614_v0  ;;  %v4031_v45 = vpack.c.bf16 %v159_v25, %v158_v43 }
0x119a   :  { %v1394_v49 = vpop.f32.mrb[20].mxu1 }
0x119b   :  { %v1399_v50 = vrot.slane %v1394_v49, 4  ;;  %v2912_v53 = vpop.f32.mrb[21].mxu1 }
0x119d   :  { %v1401_v47 = vadd.f32 %v1399_v50, %v3854_v26 }
0x119f   :  { %3268 = vtanh.f32 %v1401_v47  ;;  %v2621_v55 = vmul.f32 -1.442695, %v1401_v47 }
0x11a1   :  { %3270 = vpow2.f32 %v2621_v55 }
0x11a9   :  { %v3269_v54 = vpop.eup %3268 }
0x11aa   :  { %1414 = vrot.lane.b32.xlu0 %v3269_v54, %s3617_s1 }
0x11ab   :  { %v3271_v56 = vpop.eup %3270 }
0x11ac   :  { %v1405_v57 = vadd.f32 1.0, %v3271_v56 }
0x11ae   :  { %3272 = vrcp.f32 %v1405_v57 }
0x11b8   :  { %v3273_v58 = vpop.eup %3272 }
0x11b9   :  { %v1412_v24 = vmul.f32 %v3273_v58, %v1410_v51 }
0x121c   :  { %v1415_v59 = vpop.permute.xlu0 %1414 }
0x121d   :  { %v1417_v60 = vmul.f32 %v3273_v58, %v1415_v59 }
0x121f   :  { %1419 = vrot.lane.b32.xlu1 %v1417_v60, %s3619_s0 }
0x1291   :  { %v1420_v61 = vpop.permute.xlu1 %1419 }
0x1292   :  { %v1422_v62 = vadd.f32 %v1420_v61, %v1412_v24 }
0x1294   :  { %3274 = vtanh.f32 %v1422_v62  ;;  %v1587_v28 = vrot.slane %v1422_v62, 6 }
0x129e   :  { %v3275_v26 = vpop.eup %3274 }
0x129f   :  { %1425 = vrot.lane.b32.xlu0 %v3275_v26, %s3617_s1 }
0x1311   :  { %v1426_v63 = vpop.permute.xlu0 %1425 }
0x1312   :  { %v1428_v2 = vmul.f32 %v3273_v58, %v1426_v63 }
0x1314   :  { %v1430_v3 = vrot.slane %v1428_v2, 4  ;;  %v798_v2 = vadd.f32 %v4005_v8, %v3934_v41 }
0x1316   :  { %1431 = vrot.lane.b32.xlu1 %v1430_v3, %s3619_s0 }
0x1388   :  { %v1432_v4 = vpop.permute.xlu1 %1431 }
0x1389   :  { %2922 = vmatmul.mubr.msk.f32.vlgmr.msra.gmra.mrb[6].mxu0 %vm372_vm2, %v1432_v4  ;;  %2933 = vmatmul.mubr.msk.f32.vlgmr.msra.gmra.mrb[22].mxu1 %vm372_vm2, %v1432_v4 }
0x138a   :  { %3127 = vmatpush3.bf16.msra.mxu0 %v3859_v38  ;;  %2943 = vmatprep.mubr.msk.f32.mxu0 %vm3615_vm0, %v3616_v1 }
0x138b   :  { %3128 = vmatprep.subr.bf16.mxu0 %v3614_v0 }
0x138e   :  { %3130 = vmatpush3.bf16.msra.mxu0 %v3862_v40 }
0x138f   :  { %3131 = vmatprep.subr.bf16.mxu0 %v3614_v0 }
0x145c   :  { %v1571_v5 = vpop.f32.mrb[22].mxu1 }
0x145d   :  { %v1576_v6 = vrot.slane %v1571_v5, 2  ;;  %v2934_v7 = vpop.f32.mrb[23].mxu1 }
0x145f   :  { %v1578_v9 = vadd.f32 %v1576_v6, %v3856_v27 }
0x1461   :  { %3276 = vtanh.f32 %v1578_v9  ;;  %v2624_v40 = vmul.f32 -1.442695, %v1578_v9 }
0x1462   :  { %3278 = vtanh.f32 %v442_v10 }
0x1463   :  { %3280 = vpow2.f32 %v2624_v40 }
0x1464   :  { %3282 = vpow2.f32 %v2626_v13 }
0x146b   :  { %v3277_v38 = vpop.eup %3276 }
0x146c   :  { %1591 = vrot.lane.b32.xlu0 %v3277_v38, %s3617_s1  ;;  %v3279_v11 = vpop.eup %3278 }
0x146d   :  { %v3281_v14 = vpop.eup %3280 }
0x146e   :  { %v1582_v15 = vadd.f32 1.0, %v3281_v14  ;;  %v3283_v16 = vpop.eup %3282 }
0x146f   :  { %v1685_v17 = vadd.f32 1.0, %v3283_v16 }
0x1470   :  { %1690 = vrot.lane.b32.xlu0 %v3279_v11, %s3617_s1  ;;  %3284 = vrcp.f32 %v1582_v15 }
0x1471   :  { %3286 = vrcp.f32 %v1685_v17 }
0x147a   :  { %v3285_v27 = vpop.eup %3284 }
0x147b   :  { %v3287_v18 = vpop.eup %3286  ;;  %v1589_v29 = vmul.f32 %v3285_v27, %v1587_v28 }
0x14de   :  { %v1592_v52 = vpop.permute.xlu0 %1591 }
0x14df   :  { %v1594_v21 = vmul.f32 %v3285_v27, %v1592_v52 }
0x14e1   :  { %1596 = vrot.lane.b32.xlu1 %v1594_v21, %s3619_s0 }
0x14e2   :  { %v1691_v19 = vpop.permute.xlu0 %1690 }
0x14e3   :  { %v1693_v20 = vmul.f32 %v3287_v18, %v1691_v19 }
0x14e5   :  { %3288 = vtanh.f32 %v1693_v20 }
0x14ef   :  { %v3289_v22 = vpop.eup %3288 }
0x14f0   :  { %1696 = vrot.lane.b32.xlu0 %v3289_v22, %s3618_s17 }
0x1553   :  { %v1597_v30 = vpop.permute.xlu1 %1596 }
0x1554   :  { %v4014_v31 = vadd.f32 %v1597_v30, %v1589_v29 }
0x1556   :  { %3290 = vtanh.f32 %v4014_v31 }
0x1560   :  { %v3291_v32 = vpop.eup %3290 }
0x1561   :  { %1602 = vrot.lane.b32.xlu1 %v3291_v32, %s3617_s1 }
0x1562   :  { %v1697_v33 = vpop.permute.xlu0 %1696 }
0x1563   :  { %v4018_v34 = vmul.f32 %v3287_v18, %v1697_v33 }
0x1565   :  { %1701 = vrot.lane.b32.xlu0 %v4018_v34, %s3619_s0 }
0x1569   :  { %1784 = vrot.lane.b32.xlu0 %v1693_v20, %s3619_s0 }
0x15d3   :  { %v1603_v23 = vpop.permute.xlu1 %1602 }
0x15d4   :  { %v4023_v35 = vmul.f32 %v3285_v27, %v1603_v23 }
0x15d6   :  { %v1607_v36 = vrot.slane %v4023_v35, 6 }
0x15d7   :  { %v1702_v46 = vpop.permute.xlu0 %1701 }
0x15d8   :  { %1608 = vrot.lane.b32.xlu1 %v1607_v36, %s3619_s0 }
0x15db   :  { %v1785_v60 = vpop.permute.xlu0 %1784 }
0x164a   :  { %v1609_v44 = vpop.permute.xlu1 %1608 }
0x164b   :  { %2944 = vmatmul.mubr.msk.f32.vlgmr.msra.gmra.mrb[8].mxu0 %vm372_vm2, %v1609_v44 }
0x164c   :  { %3133 = vmatpush3.bf16.msra.mxu0 %v4027_v42  ;;  %2954 = vmatprep.mubr.msk.f32.mxu0 %vm3615_vm0, %v3616_v1 }
0x164d   :  { %3134 = vmatprep.subr.bf16.mxu0 %v3614_v0 }
0x1650   :  { %3136 = vmatpush3.bf16.msra.mxu0 %v4031_v45 }
0x1651   :  { %3137 = vmatprep.subr.bf16.mxu0 %v3614_v0 }
0x1653   :  { %2955 = vmatmul.mubr.msk.f32.vlgmr.msra.gmra.mrb[10].mxu0 %vm372_vm2, %v1702_v46 }
0x1654   :  { %3139 = vmatpush3.bf16.msra.mxu0 %v4027_v42  ;;  %2965 = vmatprep.mubr.msk.f32.mxu0 %vm3615_vm0, %v3616_v1 }
0x1655   :  { %3140 = vmatprep.subr.bf16.mxu0 %v3614_v0 }
0x1658   :  { %3142 = vmatpush3.bf16.msra.mxu0 %v4031_v45 }
0x1659   :  { %3143 = vmatprep.subr.bf16.mxu0 %v3614_v0 }
0x1726   :  { %v1771_v49 = vpop.f32.mrb[10].mxu0 }
0x1727   :  { %v1775_v50 = vadd.f32 %v1771_v49, %v621_v48  ;;  %v2956_v53 = vpop.f32.mrb[11].mxu0 }
0x1729   :  { %3292 = vtanh.f32 %v1775_v50  ;;  %v2628_v54 = vmul.f32 -1.442695, %v1775_v50 }
0x172b   :  { %3294 = vpow2.f32 %v2628_v54 }
0x1733   :  { %v3293_v47 = vpop.eup %3292 }
0x1734   :  { %1789 = vrot.lane.b32.xlu1 %v3293_v47, %s3617_s1 }
0x1735   :  { %v3295_v55 = vpop.eup %3294 }
0x1736   :  { %v1779_v56 = vadd.f32 1.0, %v3295_v55 }
0x1738   :  { %3296 = vrcp.f32 %v1779_v56 }
0x1742   :  { %v3297_v57 = vpop.eup %3296 }
0x1743   :  { %v1787_v51 = vmul.f32 %v3297_v57, %v1785_v60 }
0x17a6   :  { %v1790_v58 = vpop.permute.xlu1 %1789 }
0x17a7   :  { %v1792_v59 = vmul.f32 %v3297_v57, %v1790_v58 }
0x17a9   :  { %1794 = vrot.lane.b32.xlu1 %v1792_v59, %s3619_s0 }
0x181b   :  { %v1795_v12 = vpop.permute.xlu1 %1794 }
0x181c   :  { %v1797_v24 = vadd.f32 %v1795_v12, %v1787_v51 }
0x181e   :  { %3298 = vtanh.f32 %v1797_v24 }
0x1828   :  { %v3299_v61 = vpop.eup %3298 }
0x1829   :  { %1800 = vrot.lane.b32.xlu0 %v3299_v61, %s3617_s1 }
0x189b   :  { %v1801_v62 = vpop.permute.xlu0 %1800 }
0x189c   :  { %v1803_v26 = vmul.f32 %v3297_v57, %v1801_v62 }
0x189e   :  { %1805 = vrot.lane.b32.xlu1 %v1803_v26, %s3619_s0  ;;  %v2404_v16 = vrot.slane %v1803_v26, 6 }
0x18a0   :  { %v2418_v21 = vsel %vm2417_vm3, %v4018_v34, %v2404_v16 }
0x1910   :  { %v1806_v63 = vpop.permute.xlu1 %1805 }
0x1911   :  { %2966 = vmatmul.mubr.msk.f32.vlgmr.msra.gmra.mrb[12].mxu0 %vm372_vm2, %v1806_v63 }
0x1912   :  { %3145 = vmatpush3.bf16.msra.mxu0 %v4027_v42  ;;  %2976 = vmatprep.mubr.msk.f32.mxu0 %vm3615_vm0, %v3616_v1 }
0x1913   :  { %3146 = vmatprep.subr.bf16.mxu0 %v3614_v0 }
0x1916   :  { %3148 = vmatpush3.bf16.msra.mxu0 %v4031_v45 }
0x1917   :  { %3149 = vmatprep.subr.bf16.mxu0 %v3614_v0 }
0x19e4   :  { %v1875_v3 = vpop.f32.mrb[12].mxu0 }
0x19e5   :  { %v1879_v4 = vadd.f32 %v1875_v3, %v798_v2  ;;  %v2967_v5 = vpop.f32.mrb[13].mxu0 }
0x19e7   :  { %3300 = vtanh.f32 %v1879_v4  ;;  %v2630_v7 = vmul.f32 -1.442695, %v1879_v4 }
0x19e9   :  { %3302 = vpow2.f32 %v2630_v7 }
0x19f1   :  { %v3301_v6 = vpop.eup %3300 }
0x19f2   :  { %1889 = vrot.lane.b32.xlu0 %v3301_v6, %s3617_s1 }
0x19f3   :  { %v3303_v9 = vpop.eup %3302 }
0x19f4   :  { %v1883_v10 = vadd.f32 1.0, %v3303_v9 }
0x19f6   :  { %3304 = vrcp.f32 %v1883_v10 }
0x1a00   :  { %v3305_v38 = vpop.eup %3304 }
0x1a01   :  { %v1887_v13 = vmul.f32 %v3305_v38, %v1797_v24 }
0x1a64   :  { %v1890_v11 = vpop.permute.xlu0 %1889 }
0x1a65   :  { %v1892_v40 = vmul.f32 %v3305_v38, %v1890_v11 }
0x1a67   :  { %1894 = vrot.lane.b32.xlu1 %v1892_v40, %s3619_s0 }
0x1ad9   :  { %v1895_v14 = vpop.permute.xlu1 %1894 }
0x1ada   :  { %v1897_v41 = vadd.f32 %v1895_v14, %v1887_v13 }
0x1adc   :  { %3306 = vtanh.f32 %v1897_v41 }
0x1ae6   :  { %v3307_v15 = vpop.eup %3306 }
0x1ae7   :  { %1900 = vrot.lane.b32.xlu0 %v3307_v15, %s3617_s1 }
0x1b59   :  { %v1901_v17 = vpop.permute.xlu0 %1900 }
0x1b5a   :  { %v1903_v27 = vmul.f32 %v3305_v38, %v1901_v17 }
0x1b5c   :  { %v2406_v52 = vrot.slane %v1903_v27, 4  ;;  %1905 = vrot.lane.b32.xlu1 %v1903_v27, %s3619_s0 }
0x1b5e   :  { %v2420_v18 = vsel %vm2419_vm4, %v2418_v21, %v2406_v52 }
0x1bce   :  { %v1906_v19 = vpop.permute.xlu1 %1905 }
0x1bcf   :  { %2977 = vmatmul.mubr.msk.f32.vlgmr.msra.gmra.mrb[0].mxu0 %vm372_vm2, %v1906_v19 }
0x1bd0   :  { %3151 = vmatpush3.bf16.msra.mxu0 %v4027_v42  ;;  %2987 = vmatprep.mubr.msk.f32.mxu0 %vm3615_vm0, %v3616_v1 }
0x1bd1   :  { %3152 = vmatprep.subr.bf16.mxu0 %v3614_v0 }
0x1bd4   :  { %3154 = vmatpush3.bf16.msra.mxu0 %v4031_v45 }
0x1bd5   :  { %3155 = vmatprep.subr.bf16.mxu0 %v3614_v0 }
0x1ca2   :  { %v1975_v20 = vpop.f32.mrb[0].mxu0 }
0x1ca3   :  { %v3185_v22 = vadd.f32 %v4005_v8, %v1975_v20  ;;  %v2978_v28 = vpop.f32.mrb[1].mxu0 }
0x1ca5   :  { %3308 = vtanh.f32 %v3185_v22  ;;  %v2632_v30 = vmul.f32 -1.442695, %v3185_v22 }
0x1ca7   :  { %3310 = vpow2.f32 %v2632_v30 }
0x1caf   :  { %v3309_v29 = vpop.eup %3308 }
0x1cb0   :  { %1989 = vrot.lane.b32.xlu0 %v3309_v29, %s3617_s1 }
0x1cb1   :  { %v3311_v32 = vpop.eup %3310 }
0x1cb2   :  { %v1983_v33 = vadd.f32 1.0, %v3311_v32 }
0x1cb4   :  { %3312 = vrcp.f32 %v1983_v33 }
0x1cbe   :  { %v3313_v34 = vpop.eup %3312 }
0x1cbf   :  { %v1987_v37 = vmul.f32 %v3313_v34, %v1897_v41 }
0x1d22   :  { %v1990_v23 = vpop.permute.xlu0 %1989 }
0x1d23   :  { %v1992_v36 = vmul.f32 %v3313_v34, %v1990_v23 }
0x1d25   :  { %1994 = vrot.lane.b32.xlu1 %v1992_v36, %s3619_s0 }
0x1d97   :  { %v1995_v39 = vpop.permute.xlu1 %1994 }
0x1d98   :  { %v1997_v43 = vadd.f32 %v1995_v39, %v1987_v37 }
0x1d9a   :  { %3314 = vtanh.f32 %v1997_v43 }
0x1da4   :  { %v3315_v25 = vpop.eup %3314 }
0x1da5   :  { %2000 = vrot.lane.b32.xlu0 %v3315_v25, %s3617_s1 }
0x1e17   :  { %v2001_v44 = vpop.permute.xlu0 %2000 }
0x1e18   :  { %v2003_v46 = vmul.f32 %v3313_v34, %v2001_v44 }
0x1e1a   :  { %v2408_v48 = vrot.slane %v2003_v46, 2  ;;  %2005 = vrot.lane.b32.xlu1 %v2003_v46, %s3619_s0 }
0x1e1c   :  { %v4080_v49 = vsel %vm2421_vm5, %v2420_v18, %v2408_v48 }
0x1e8c   :  { %v2006_v50 = vpop.permute.xlu1 %2005 }
0x1e8d   :  { %2988 = vmatmul.mubr.msk.f32.vlgmr.msra.gmra.mrb[2].mxu0 %vm372_vm2, %v2006_v50 }
0x1e8e   :  { %3157 = vmatpush3.bf16.msra.mxu0 %v4027_v42  ;;  %2998 = vmatprep.mubr.msk.f32.mxu0 %vm3615_vm0, %v3616_v1 }
0x1e8f   :  { %3158 = vmatprep.subr.bf16.mxu0 %v3614_v0 }
0x1e92   :  { %3160 = vmatpush3.bf16.msra.mxu0 %v4031_v45 }
0x1e93   :  { %3161 = vmatprep.subr.bf16.mxu0 %v3614_v0 }
0x1f60   :  { %v2075_v53 = vpop.f32.mrb[2].mxu0 }
0x1f61   :  { %v3186_v47 = vadd.f32 %v4005_v8, %v2075_v53  ;;  %v2989_v54 = vpop.f32.mrb[3].mxu0 }
0x1f63   :  { %3316 = vtanh.f32 %v3186_v47  ;;  %v2634_v56 = vmul.f32 -1.442695, %v3186_v47 }
0x1f65   :  { %3318 = vpow2.f32 %v2634_v56 }
0x1f6d   :  { %v3317_v55 = vpop.eup %3316 }
0x1f6e   :  { %2089 = vrot.lane.b32.xlu0 %v3317_v55, %s3617_s1 }
0x1f6f   :  { %v3319_v57 = vpop.eup %3318 }
0x1f70   :  { %v2083_v58 = vadd.f32 1.0, %v3319_v57 }
0x1f72   :  { %3320 = vrcp.f32 %v2083_v58 }
0x1f7c   :  { %v3321_v59 = vpop.eup %3320 }
0x1f7d   :  { %v2087_v12 = vmul.f32 %v3321_v59, %v1997_v43 }
0x1fe0   :  { %v2090_v60 = vpop.permute.xlu0 %2089 }
0x1fe1   :  { %v2092_v51 = vmul.f32 %v3321_v59, %v2090_v60 }
0x1fe3   :  { %2094 = vrot.lane.b32.xlu1 %v2092_v51, %s3619_s0 }
0x2055   :  { %v2095_v24 = vpop.permute.xlu1 %2094 }
0x2056   :  { %v2097_v61 = vadd.f32 %v2095_v24, %v2087_v12 }
0x2058   :  { %3322 = vtanh.f32 %v2097_v61 }
0x2062   :  { %v3323_v62 = vpop.eup %3322 }
0x2063   :  { %2100 = vrot.lane.b32.xlu0 %v3323_v62, %s3617_s1 }
0x20d5   :  { %v2101_v26 = vpop.permute.xlu0 %2100 }
0x20d6   :  { %v4093_v63 = vmul.f32 %v3321_v59, %v2101_v26 }
0x20d8   :  { %2105 = vrot.lane.b32.xlu1 %v4093_v63, %s3619_s0 }
0x214a   :  { %v2106_v2 = vpop.permute.xlu1 %2105 }
0x214b   :  { %2999 = vmatmul.mubr.msk.f32.vlgmr.msra.gmra.mrb[4].mxu0 %vm372_vm2, %v2106_v2 }
0x214c   :  { %3163 = vmatpush3.bf16.msra.mxu0 %v4027_v42  ;;  %3009 = vmatprep.mubr.msk.f32.mxu0 %vm3615_vm0, %v3616_v1 }
0x214d   :  { %3164 = vmatprep.subr.bf16.mxu0 %v3614_v0 }
0x2150   :  { %3166 = vmatpush3.bf16.msra.mxu0 %v4031_v45 }
0x2151   :  { %3167 = vmatprep.subr.bf16.mxu0 %v3614_v0 }
0x221e   :  { %v2175_v3 = vpop.f32.mrb[4].mxu0 }
0x221f   :  { %v3187_v4 = vadd.f32 %v4005_v8, %v2175_v3  ;;  %v3000_v5 = vpop.f32.mrb[5].mxu0 }
0x2221   :  { %3324 = vtanh.f32 %v3187_v4  ;;  %v2636_v7 = vmul.f32 -1.442695, %v3187_v4 }
0x2223   :  { %3326 = vpow2.f32 %v2636_v7 }
0x222b   :  { %v3325_v6 = vpop.eup %3324 }
0x222c   :  { %2189 = vrot.lane.b32.xlu0 %v3325_v6, %s3617_s1 }
0x222d   :  { %v3327_v9 = vpop.eup %3326 }
0x222e   :  { %v2183_v10 = vadd.f32 1.0, %v3327_v9 }
0x2230   :  { %3328 = vrcp.f32 %v2183_v10 }
0x223a   :  { %v3329_v38 = vpop.eup %3328 }
0x223b   :  { %v2187_v13 = vmul.f32 %v3329_v38, %v2097_v61  ;;  %v2429_v61 = vld [vmem:[%s4207_s9 + $0x18] sm:$0xff] }
0x229e   :  { %v2190_v11 = vpop.permute.xlu0 %2189 }
0x229f   :  { %v2192_v40 = vmul.f32 %v3329_v38, %v2190_v11 }
0x22a1   :  { %2194 = vrot.lane.b32.xlu1 %v2192_v40, %s3619_s0 }
0x2313   :  { %v2195_v14 = vpop.permute.xlu1 %2194 }
0x2314   :  { %v2197_v41 = vadd.f32 %v2195_v14, %v2187_v13 }
0x2316   :  { %3330 = vtanh.f32 %v2197_v41 }
0x2320   :  { %v3331_v15 = vpop.eup %3330 }
0x2321   :  { %2200 = vrot.lane.b32.xlu0 %v3331_v15, %s3617_s1 }
0x2393   :  { %v2201_v16 = vpop.permute.xlu0 %2200 }
0x2394   :  { %v2203_v17 = vmul.f32 %v3329_v38, %v2201_v16 }
0x2396   :  { %2205 = vrot.lane.b32.xlu1 %v2203_v17, %s3619_s0  ;;  %v2410_v33 = vrot.slane %v2203_v17, 6 }
0x2398   :  { %v2423_v37 = vsel %vm2417_vm3, %v4093_v63, %v2410_v33 }
0x2408   :  { %v2206_v27 = vpop.permute.xlu1 %2205 }
0x2409   :  { %3010 = vmatmul.mubr.msk.f32.vlgmr.msra.gmra.mrb[6].mxu0 %vm372_vm2, %v2206_v27 }
0x240a   :  { %3169 = vmatpush3.bf16.msra.mxu0 %v4027_v42  ;;  %3020 = vmatprep.mubr.msk.f32.mxu0 %vm3615_vm0, %v3616_v1 }
0x240b   :  { %3170 = vmatprep.subr.bf16.mxu0 %v3614_v0 }
0x240e   :  { %3172 = vmatpush3.bf16.msra.mxu0 %v4031_v45 }
0x24dc   :  { %v2275_v52 = vpop.f32.mrb[6].mxu0 }
0x24dd   :  { %v3188_v21 = vadd.f32 %v4005_v8, %v2275_v52  ;;  %v3011_v18 = vpop.f32.mrb[7].mxu0 }
0x24df   :  { %3332 = vtanh.f32 %v3188_v21  ;;  %v2638_v20 = vmul.f32 -1.442695, %v3188_v21 }
0x24e1   :  { %3334 = vpow2.f32 %v2638_v20 }
0x24e9   :  { %v3333_v19 = vpop.eup %3332 }
0x24ea   :  { %2289 = vrot.lane.b32.xlu0 %v3333_v19, %s3617_s1 }
0x24eb   :  { %v3335_v22 = vpop.eup %3334 }
0x24ec   :  { %v2283_v28 = vadd.f32 1.0, %v3335_v22 }
0x24ee   :  { %3336 = vrcp.f32 %v2283_v28 }
0x24f8   :  { %v3337_v42 = vpop.eup %3336 }
0x24f9   :  { %v2287_v0 = vmul.f32 %v3337_v42, %v2197_v41 }
0x255c   :  { %v2290_v29 = vpop.permute.xlu0 %2289 }
0x255d   :  { %v2292_v1 = vmul.f32 %v3337_v42, %v2290_v29 }
0x255f   :  { %2294 = vrot.lane.b32.xlu1 %v2292_v1, %s3619_s0 }
0x25d1   :  { %v2295_v45 = vpop.permute.xlu1 %2294 }
0x25d2   :  { %v2297_v30 = vadd.f32 %v2295_v45, %v2287_v0 }
0x25d4   :  { %3338 = vtanh.f32 %v2297_v30 }
0x25de   :  { %v3339_v32 = vpop.eup %3338 }
0x25df   :  { %2300 = vrot.lane.b32.xlu0 %v3339_v32, %s3617_s1 }
0x2651   :  { %v2301_v34 = vpop.permute.xlu0 %2300 }
0x2652   :  { %v2303_v23 = vmul.f32 %v3337_v42, %v2301_v34 }
0x2654   :  { %v2412_v36 = vrot.slane %v2303_v23, 4  ;;  %2305 = vrot.lane.b32.xlu1 %v2303_v23, %s3619_s0 }
0x2656   :  { %v2424_v39 = vsel %vm2419_vm4, %v2423_v37, %v2412_v36 }
0x26c6   :  { %v2306_v43 = vpop.permute.xlu1 %2305 }
0x26c7   :  { %3021 = vmatmul.mubr.msk.f32.vlgmr.msra.gmra.mrb[8].mxu0 %vm372_vm2, %v2306_v43 }
0x279a   :  { %v2375_v25 = vpop.f32.mrb[8].mxu0 }
0x279b   :  { %v3189_v44 = vadd.f32 %v4005_v8, %v2375_v25  ;;  %v3022_v46 = vpop.f32.mrb[9].mxu0 }
0x279d   :  { %3340 = vtanh.f32 %v3189_v44  ;;  %v2640_v50 = vmul.f32 -1.442695, %v3189_v44 }
0x279f   :  { %3342 = vpow2.f32 %v2640_v50 }
0x27a7   :  { %v3341_v48 = vpop.eup %3340 }
0x27a8   :  { %2389 = vrot.lane.b32.xlu0 %v3341_v48, %s3617_s1 }
0x27a9   :  { %v3343_v53 = vpop.eup %3342 }
0x27aa   :  { %v2383_v47 = vadd.f32 1.0, %v3343_v53 }
0x27ac   :  { %3344 = vrcp.f32 %v2383_v47 }
0x27b6   :  { %v3345_v54 = vpop.eup %3344 }
0x27b7   :  { %v2387_v8 = vmul.f32 %v3345_v54, %v2297_v30 }
0x281a   :  { %v2390_v55 = vpop.permute.xlu0 %2389 }
0x281b   :  { %v2392_v56 = vmul.f32 %v3345_v54, %v2390_v55 }
0x281d   :  { %2394 = vrot.lane.b32.xlu1 %v2392_v56, %s3619_s0 }
0x2821   :  { %2439 = vrot.lane.b32.xlu1 %v4080_v49, %s3619_s0  ;;  %v2428_v49 = vld [vmem:[%s4207_s9 + $0x10] sm:$0xff] }
0x2822   :  { %v3177_v62 = vpack.c.bf16 %v2429_v61, %v2428_v49 }
0x2825   :  { %2524 = vrot.lane.b32.xlu1 %v4023_v35, %s3619_s0  ;;  %v2426_v35 = vld [vmem:[%s4207_s9] sm:$0xff] }
0x2829   :  { %2536 = vrot.lane.b32.xlu1 %v4014_v31, %s3618_s17  ;;  %v2427_v31 = vld [vmem:[%s4207_s9 + $0x8] sm:$0xff]  ;;  %s3620_s9 = smov [#allocation17]  }
0x282a   :  { %v3173_v24 = vpack.c.bf16 %v2427_v31, %v2426_v35  ;;  %s2563_s18 = sshll.u32 %s3620_s9, 4  ;;  %s2564_s18 = int_to_ptr.vmem [resolvable:$true] %s2563_s18 }
0x282b   :  { %s3524_s27 = scalar_lea.vmem %s2564_s18, 64  ;;  %p3529_p9 = scmp.lt.s32.totalorder %s2564_s18, %s2564_s18 }
0x282c   :  { %3174 = vmatprep.subr.bf16.mxu1 %v3173_v24  ;;  %p3525_p8 = scmp.ne.s32.totalorder %s2564_s18, %s3524_s27  ;;  %p3530_p10 = scmp.lt.s32.totalorder %s3524_s27, %s3524_s27 }
0x282d   :  { %3176 = vmatpush3.bf16.msra.mxu1 %v3173_v24 }
0x282e   :  { %3178 = vmatprep.subr.bf16.mxu1 %v3177_v62  ;;  %p3531_p11 = por %p3530_p10, %p3529_p9 }
0x2830   :  { %p3532_p12 = pnand %p3531_p11, %p3525_p8 }
0x2831   :  { %3180 = vmatpush3.bf16.msra.mxu1 %v3177_v62 }
0x288f   :  { %v2395_v57 = vpop.permute.xlu1 %2394 }
0x2890   :  { %v2397_v58 = vadd.f32 %v2395_v57, %v2387_v8 }
0x2892   :  { %3346 = vtanh.f32 %v2397_v58 }
0x2893   :  { %v2440_v59 = vpop.permute.xlu1 %2439 }
0x2894   :  { %3031 = vmatprep.mubr.msk.f32.mxu1 %vm372_vm2, %v2440_v59 }
0x2897   :  { %v2525_v60 = vpop.permute.xlu1 %2524 }
0x2898   :  { %2528 = vst.msk [vmem:[#allocation17 - $0x6] sm:$0xc0] %vm2527_vm6, %v2525_v60 }
0x289b   :  { %v2537_v51 = vpop.permute.xlu1 %2536 }
0x289c   :  { %v3347_v12 = vpop.eup %3346  ;;  %2539 = vst.msk [vmem:[#allocation19 - $0x6] sm:$0xc0] %vm2527_vm6, %v2537_v51 }
0x289d   :  { %2400 = vrot.lane.b32.xlu0 %v3347_v12, %s3617_s1 }
0x290f   :  { %v2401_v26 = vpop.permute.xlu0 %2400 }
0x2910   :  { %v2403_v63 = vmul.f32 %v3345_v54, %v2401_v26 }
0x2912   :  { %v2415_v2 = vrot.slane %v2403_v63, 2 }
0x2914   :  { %v2425_v3 = vsel %vm2421_vm5, %v2424_v39, %v2415_v2 }
0x2915   :  { %2441 = vrot.lane.b32.xlu0 %v2425_v3, %s3619_s0 }
0x2919   :  { %2529 = vrot.lane.b32.xlu0 %v2403_v63, %s3619_s0 }
0x291d   :  { %2541 = vrot.lane.b32.xlu0 %v2397_v58, %s3618_s17 }
0x2987   :  { %v2442_v4 = vpop.permute.xlu0 %2441 }
0x2988   :  { %3032 = vmatmul.mubr.msk.f32.vlgmr.msra.gmra.mrb[24].mxu1 %vm372_vm2, %v2442_v4 }
0x298b   :  { %v2530_v5 = vpop.permute.xlu0 %2529 }
0x298c   :  { %2534 = vst.msk [vmem:[#allocation17 + $0x2] sm:$0x3] %vm2533_vm7, %v2530_v5 }
0x298f   :  { %v2542_v6 = vpop.permute.xlu0 %2541 }
0x2990   :  { %2545 = vst.msk [vmem:[#allocation19 + $0x2] sm:$0x3] %vm2533_vm7, %v2542_v6 }
0x2991   :  { %3535 = shalt.err (!%p3532_p12)
}
0x2992   :  { %s3536_s3 = scalar_lea.hbm %s4210_s12, 64 }
0x2993   :  { %p3537_p13 = scmp.ne.s32.totalorder %s4210_s12, %s3536_s3  ;;  %p3540_p0 = scmp.lt.u32.totalorder %s3536_s3, %s4210_s12 }
0x2995   :  { %p3542_p1 = pnand %p3540_p0, %p3537_p13 }
0x2997   :  { %3545 = shalt.err (!%p3542_p1)
}
0x2998   :  { %s3621_s7 = smov 2   ;;  %s3622_s2 = smov [#allocation19]  }
0x2999   :  { %2569 = dma.vmem_to_hbm [thread:$0]  %s2564_s18, 64, %s4210_s12, [#allocation18], %s3619_s0, %s3619_s0, %s3621_s7  }
0x299a   :  { %s2575_s1 = sshll.u32 %s3622_s2, 4  ;;  %s2576_s1 = int_to_ptr.vmem [resolvable:$true] %s2575_s1 }
0x299b   :  { %s3546_s17 = scalar_lea.vmem %s2576_s1, 64  ;;  %p3551_p3 = scmp.lt.s32.totalorder %s2576_s1, %s2576_s1 }
0x299c   :  { %p3547_p2 = scmp.ne.s32.totalorder %s2576_s1, %s3546_s17  ;;  %p3552_p4 = scmp.lt.s32.totalorder %s3546_s17, %s3546_s17 }
0x299e   :  { %p3553_p5 = por %p3552_p4, %p3551_p3 }
0x29a0   :  { %p3554_p6 = pnand %p3553_p5, %p3547_p2 }
0x29a2   :  { %3557 = shalt.err (!%p3554_p6)
}
0x29a3   :  { %s3558_s23 = scalar_lea.hbm %s4211_s13, 64 }
0x29a4   :  { %p3559_p7 = scmp.ne.s32.totalorder %s4211_s13, %s3558_s23  ;;  %p3562_p8 = scmp.lt.u32.totalorder %s3558_s23, %s4211_s13 }
0x29a6   :  { %p3564_p9 = pnand %p3562_p8, %p3559_p7 }
0x29a8   :  { %3567 = shalt.err (!%p3564_p9)
}
0x29a9   :  { %2581 = dma.vmem_to_hbm [thread:$0]  %s2576_s1, 64, %s4211_s13, [#allocation18], %s3619_s0, %s3619_s0, %s3621_s7  }
0x29aa   :  { %v2641_v7 = vld [vmem:[%s4208_s10] ss:$0 sm:$0xff]  ;;  %s3623_s27 = smov [#allocation16]  }
0x29ab   :  { %s2551_s30 = sshll.u32 %s3623_s27, 4  ;;  %s2552_s30 = int_to_ptr.vmem [resolvable:$true] %s2551_s30 }
0x29ac   :  { %s3568_s4 = scalar_lea.vmem %s2552_s30, 256  ;;  %p3573_p11 = scmp.lt.s32.totalorder %s2552_s30, %s2552_s30 }
0x29ad   :  { %p3569_p10 = scmp.ne.s32.totalorder %s2552_s30, %s3568_s4  ;;  %p3574_p12 = scmp.lt.s32.totalorder %s3568_s4, %s3568_s4 }
0x29af   :  { %p3575_p13 = por %p3574_p12, %p3573_p11 }
0x29b1   :  { %p3576_p0 = pnand %p3575_p13, %p3569_p10 }
0x2a5b   :  { %v3033_v9 = vpop.f32.mrb[24].mxu1 }
0x2a5c   :  { %v2519_v10 = vadd.f32 %v3033_v9, %v2641_v7  ;;  %v2513_v38 = vpop.f32.mrb[25].mxu1 }
0x2a5d   :  { %v2514_v11 = vadd.f32 %v2641_v7, %v2513_v38 }
0x2a5e   :  { %2523 = vst [vmem:[#allocation16 + $0x8] sm:$0xff] %v2519_v10 }
0x2a5f   :  { %2522 = vst [vmem:[#allocation16] sm:$0xff] %v2514_v11 }
0x2a60   :  { %3579 = shalt.err (!%p3576_p0)
}
0x2a61   :  { %s3580_s10 = scalar_lea.hbm %s4209_s11, 256 }
0x2a62   :  { %p3581_p1 = scmp.ne.s32.totalorder %s4209_s11, %s3580_s10  ;;  %p3584_p2 = scmp.lt.u32.totalorder %s3580_s10, %s4209_s11 }
0x2a64   :  { %p3586_p3 = pnand %p3584_p2, %p3581_p1 }
0x2a66   :  { %3589 = shalt.err (!%p3586_p3)
}
0x2a67   :  { %2557 = dma.vmem_to_hbm [thread:$0]  %s2552_s30, 256, %s4209_s11, [#allocation4], %s3606_s20, %s3606_s20, %s3607_s21  }
0x2a68   :  { %3600 = dma.done.wait [#allocation4], 256  }
0x2a69   :  { %3601 = vsyncadd [#allocation4], 4294967040 }
0x2a6a   :  { %3602 = dma.done.wait [#allocation18], 128  }
0x2a6b   :  { %3603 = vsyncadd [#allocation18], 4294967168 }
0x2a6c   :  { %2591 = vsyncpa [#allocation3], 1 }
0x2a6d   :  { %2592 = vsyncpa [#allocation6], 1 }
0x2a6e   :  { %2593 = vsyncpa [#allocation9], 1 }
0x2a6f   :  { %2594 = vsyncpa [#allocation12], 1 }
0x2a70   :  { %2595 = vsyncpa [#allocation15], 1 }
0x2a71   :  { %2596 = vsyncpa [#allocation4], 1 }
0x2a72   :  { %2597 = vsyncpa [#allocation18], 1 }

</bundles_post_ra>
